<compile_context>
chip_gen: v5e
topology: v5e:2x2
jax: 0.10.0
libtpu: 0.0.40
codegen_flags: <defaults>
</compile_context>

<pallas_src>
import jax
import jax.numpy as jnp
from jax.experimental import pallas as pl
from jax.experimental.pallas import tpu as pltpu

K = 5     # kernel size of both convs
C1 = 32   # conv1 output channels
C2 = 64   # conv2 output channels
TB = 8    # batch rows per grid step (multiple of the 8-sublane tile)


def conv_encoder_kernel(x_ref, w1_ref, w2f_ref, b2e_ref, s0_ref, out_ref):
    tb, L_in = x_ref.shape
    L1 = L_in - (K - 1)     # length after conv1
    L2 = L1 - (K - 1)       # length after conv2
    Lp = L2 // 2            # length after maxpool(2)

    x = x_ref[...]          # (TB, L_in) f32
    w1 = w1_ref[...]        # (K, C1)

    # ---- conv1 (bias folded into conv2's bias): 5 broadcast MACs on the VPU ----
    # NOTE: the reference module applies ReLU only after conv2, so conv1 stays linear.
    y1 = x[:, 0:L1, None] * w1[0][None, None, :]
    for m in range(1, K):
        y1 = y1 + x[:, m:m + L1, None] * w1[m][None, None, :]           # (TB, L1, C1)

    # ---- conv2 as ONE MXU matmul over an im2col of y1 ----
    # P2[b, t, k*C1 + c] = y1[b, t + k, c]   ->   (TB*L2, K*C1) @ (K*C1, C2)
    p2 = jnp.concatenate([y1[:, k:k + L2, :] for k in range(K)], axis=2)  # (TB, L2, 160)
    p2 = p2.reshape(tb * L2, K * C1)                                      # (TB*L2, 160)
    y2 = jnp.dot(p2, w2f_ref[...], preferred_element_type=jnp.float32)    # (TB*L2, C2)
    y2 = jnp.maximum(y2 + b2e_ref[...], 0.0)                              # bias + ReLU
    y2 = y2.reshape(tb, L2, C2)                                           # (TB, L2, C2)

    # ---- MaxPool1d(2) + (t, c) -> torch-flatten lane index c*Lp + t, in registers ----
    pairs = jnp.maximum(y2[:, 0:L2 - 1, :], y2[:, 1:L2, :])               # (TB, L2-1, C2)
    s0 = s0_ref[...]                                                      # (C2, C2*Lp), one-hot at [c, c*Lp]
    out = jnp.zeros((tb, C2 * Lp), jnp.float32)
    for t in range(Lp):
        slab = pairs[:, 2 * t, :]                                         # (TB, C2): pooled timestep t
        scat = jnp.dot(slab, s0, preferred_element_type=jnp.float32)      # channel c -> lane c*Lp
        out = out + (scat if t == 0 else jnp.roll(scat, t, axis=1))       # -> lane c*Lp + t
    out_ref[...] = out                                                    # unmasked 512-lane stores


def conv_encoder_forward(x, w1_oik, b1, w2_oik, b2, *, tb=TB):
    """x: (B, input_dim) f32.  Weights in PyTorch Conv1d (O, I, K) layout."""
    B, L_in = x.shape
    L1 = L_in - (K - 1)
    L2 = L1 - (K - 1)
    Lp = L2 // 2
    F = C2 * Lp

    # One-time parameter prep (wrapper glue, outside the kernel):
    w1_kc = jnp.transpose(w1_oik[:, 0, :], (1, 0)).astype(jnp.float32)            # (K, C1)
    w2f = jnp.transpose(w2_oik, (2, 1, 0)).reshape(K * C1, C2).astype(jnp.float32)  # (K*C1, C2)
    # Fold conv1 bias: b2_eff[o] = b2[o] + sum_{k,c} b1[c] * w2[o, c, k]   (exact)
    b2_eff = (b2 + jnp.einsum('ock,c->o', w2_oik, b1)).reshape(1, C2).astype(jnp.float32)
    # One-hot scatter matrix: channel c -> output lane c*Lp (in-kernel lane roll adds +t).
    s0 = jax.nn.one_hot(jnp.arange(C2) * Lp, F, dtype=jnp.float32)                # (C2, F)

    # Pad batch up to a multiple of the tile so every block is 8-row aligned.
    Bp = ((B + tb - 1) // tb) * tb
    xp = x if Bp == B else jnp.pad(x, ((0, Bp - B), (0, 0)))

    out = pl.pallas_call(
        conv_encoder_kernel,
        out_shape=jax.ShapeDtypeStruct((Bp, F), jnp.float32),
        grid=(Bp // tb,),
        in_specs=[
            pl.BlockSpec((tb, L_in), lambda i: (i, 0)),        # x: tiled over batch
            pl.BlockSpec((K, C1), lambda i: (0, 0)),           # conv1 weight (resident)
            pl.BlockSpec((K * C1, C2), lambda i: (0, 0)),      # conv2 weight, im2col layout
            pl.BlockSpec((1, C2), lambda i: (0, 0)),           # folded bias
            pl.BlockSpec((C2, F), lambda i: (0, 0)),           # one-hot scatter matrix
        ],
        out_specs=pl.BlockSpec((tb, F), lambda i: (i, 0)),     # lane-dense (TB, 512) blocks
        compiler_params=pltpu.CompilerParams(
            dimension_semantics=("parallel",)),                # 2x on v7x megacore
    )(xp, w1_kc, w2f, b2_eff, s0)

    return out[:B]          # already in torch.flatten(start_dim=1) order


def reference(x, w1, b1, w2, b2):
    """Pure-JAX reference mirroring the PyTorch forward (NCW conv semantics)."""
    xi = x[:, None, :]  # (B, 1, L)
    dn1 = jax.lax.conv_dimension_numbers(xi.shape, w1.shape, ('NCH', 'OIH', 'NCH'))
    y1 = jax.lax.conv_general_dilated(xi, w1, (1,), 'VALID',
                                      dimension_numbers=dn1) + b1[None, :, None]
    dn2 = jax.lax.conv_dimension_numbers(y1.shape, w2.shape, ('NCH', 'OIH', 'NCH'))
    y2 = jax.lax.conv_general_dilated(y1, w2, (1,), 'VALID',
                                      dimension_numbers=dn2) + b2[None, :, None]
    y2 = jnp.maximum(y2, 0.0)
    Bb, C, L2 = y2.shape
    pooled = jnp.max(y2.reshape(Bb, C, L2 // 2, 2), axis=-1)
    return pooled.reshape(Bb, -1)


if __name__ == "__main__":
    input_dim = 24   # -> latent dim 32*(input_dim-8) = 512, the module default
    batch = 4

    key = jax.random.PRNGKey(0)
    k1, k2, k3, k4, k5 = jax.random.split(key, 5)
    x = jax.random.normal(k1, (batch, input_dim), jnp.float32)
    # Deterministic synthetic parameters in PyTorch Conv1d shapes.
    w1 = jax.random.normal(k2, (C1, 1, K), jnp.float32) * 0.2    # conv1.weight
    b1 = jax.random.normal(k3, (C1,), jnp.float32) * 0.1         # conv1.bias
    w2 = jax.random.normal(k4, (C2, C1, K), jnp.float32) * 0.1   # conv2.weight
    b2 = jax.random.normal(k5, (C2,), jnp.float32) * 0.1         # conv2.bias

    out = jax.block_until_ready(conv_encoder_forward(x, w1, b1, w2, b2))
    ref = reference(x, w1, b1, w2, b2)

    assert out.shape == (batch, C2 * ((input_dim - 8) // 2)), out.shape
    assert jnp.allclose(out, ref, atol=1e-4, rtol=1e-4), float(jnp.max(jnp.abs(out - ref)))
    print("KERNEL_OK")
</pallas_src>

<mosaic_0001>
module attributes {stable_mosaic.version = 11 : i64} {
  func.func @conv_encoder_kernel(%arg0: i32, %arg1: memref<8x24xf32, #tpu.memory_space<vmem>>, %arg2: memref<5x32xf32, #tpu.memory_space<vmem>>, %arg3: memref<160x64xf32, #tpu.memory_space<vmem>>, %arg4: memref<1x64xf32, #tpu.memory_space<vmem>>, %arg5: memref<64x512xf32, #tpu.memory_space<vmem>>, %arg6: memref<8x512xf32, #tpu.memory_space<vmem>>) attributes {dimension_semantics = [#tpu.dimension_semantics<parallel>], iteration_bounds = array<i64: 1>, scalar_prefetch = 0 : i64, scratch_operands = 0 : i64, tpu.core_type = #tpu.core_type<tc>, window_params = [{transform_indices = @transform_0, window_bounds = array<i64: 8, 24>}, {pipeline_mode = #tpu.pipeline_mode<synchronous>, transform_indices = @transform_1, window_bounds = array<i64: 5, 32>}, {pipeline_mode = #tpu.pipeline_mode<synchronous>, transform_indices = @transform_2, window_bounds = array<i64: 160, 64>}, {pipeline_mode = #tpu.pipeline_mode<synchronous>, transform_indices = @transform_3, window_bounds = array<i64: 1, 64>}, {pipeline_mode = #tpu.pipeline_mode<synchronous>, transform_indices = @transform_4, window_bounds = array<i64: 64, 512>}, {transform_indices = @transform_5, window_bounds = array<i64: 8, 512>}]} {
    %c0 = arith.constant 0 : index
    %c0_0 = arith.constant 0 : index
    %0 = vector.load %arg1[%c0, %c0_0] : memref<8x24xf32, #tpu.memory_space<vmem>>, vector<8x24xf32>
    %c0_1 = arith.constant 0 : index
    %c0_2 = arith.constant 0 : index
    %1 = vector.load %arg2[%c0_1, %c0_2] : memref<5x32xf32, #tpu.memory_space<vmem>>, vector<5x32xf32>
    %2 = vector.extract_strided_slice %0 {offsets = [0, 0], sizes = [8, 20], strides = [1, 1]} : vector<8x24xf32> to vector<8x20xf32>
    %3 = vector.shape_cast %2 : vector<8x20xf32> to vector<8x20x1xf32>
    %4 = vector.extract_strided_slice %1 {offsets = [0, 0], sizes = [1, 32], strides = [1, 1]} : vector<5x32xf32> to vector<1x32xf32>
    %5 = vector.shape_cast %4 : vector<1x32xf32> to vector<32xf32>
    %6 = vector.shape_cast %5 : vector<32xf32> to vector<1x1x32xf32>
    %7 = vector.broadcast %3 : vector<8x20x1xf32> to vector<8x20x32xf32>
    %8 = vector.broadcast %6 : vector<1x1x32xf32> to vector<8x20x32xf32>
    %9 = arith.mulf %7, %8 : vector<8x20x32xf32>
    %10 = vector.extract_strided_slice %0 {offsets = [0, 1], sizes = [8, 20], strides = [1, 1]} : vector<8x24xf32> to vector<8x20xf32>
    %11 = vector.shape_cast %10 : vector<8x20xf32> to vector<8x20x1xf32>
    %12 = vector.extract_strided_slice %1 {offsets = [1, 0], sizes = [1, 32], strides = [1, 1]} : vector<5x32xf32> to vector<1x32xf32>
    %13 = vector.shape_cast %12 : vector<1x32xf32> to vector<32xf32>
    %14 = vector.shape_cast %13 : vector<32xf32> to vector<1x1x32xf32>
    %15 = vector.broadcast %11 : vector<8x20x1xf32> to vector<8x20x32xf32>
    %16 = vector.broadcast %14 : vector<1x1x32xf32> to vector<8x20x32xf32>
    %17 = arith.mulf %15, %16 : vector<8x20x32xf32>
    %18 = arith.addf %9, %17 : vector<8x20x32xf32>
    %19 = vector.extract_strided_slice %0 {offsets = [0, 2], sizes = [8, 20], strides = [1, 1]} : vector<8x24xf32> to vector<8x20xf32>
    %20 = vector.shape_cast %19 : vector<8x20xf32> to vector<8x20x1xf32>
    %21 = vector.extract_strided_slice %1 {offsets = [2, 0], sizes = [1, 32], strides = [1, 1]} : vector<5x32xf32> to vector<1x32xf32>
    %22 = vector.shape_cast %21 : vector<1x32xf32> to vector<32xf32>
    %23 = vector.shape_cast %22 : vector<32xf32> to vector<1x1x32xf32>
    %24 = vector.broadcast %20 : vector<8x20x1xf32> to vector<8x20x32xf32>
    %25 = vector.broadcast %23 : vector<1x1x32xf32> to vector<8x20x32xf32>
    %26 = arith.mulf %24, %25 : vector<8x20x32xf32>
    %27 = arith.addf %18, %26 : vector<8x20x32xf32>
    %28 = vector.extract_strided_slice %0 {offsets = [0, 3], sizes = [8, 20], strides = [1, 1]} : vector<8x24xf32> to vector<8x20xf32>
    %29 = vector.shape_cast %28 : vector<8x20xf32> to vector<8x20x1xf32>
    %30 = vector.extract_strided_slice %1 {offsets = [3, 0], sizes = [1, 32], strides = [1, 1]} : vector<5x32xf32> to vector<1x32xf32>
    %31 = vector.shape_cast %30 : vector<1x32xf32> to vector<32xf32>
    %32 = vector.shape_cast %31 : vector<32xf32> to vector<1x1x32xf32>
    %33 = vector.broadcast %29 : vector<8x20x1xf32> to vector<8x20x32xf32>
    %34 = vector.broadcast %32 : vector<1x1x32xf32> to vector<8x20x32xf32>
    %35 = arith.mulf %33, %34 : vector<8x20x32xf32>
    %36 = arith.addf %27, %35 : vector<8x20x32xf32>
    %37 = vector.extract_strided_slice %0 {offsets = [0, 4], sizes = [8, 20], strides = [1, 1]} : vector<8x24xf32> to vector<8x20xf32>
    %38 = vector.shape_cast %37 : vector<8x20xf32> to vector<8x20x1xf32>
    %39 = vector.extract_strided_slice %1 {offsets = [4, 0], sizes = [1, 32], strides = [1, 1]} : vector<5x32xf32> to vector<1x32xf32>
    %40 = vector.shape_cast %39 : vector<1x32xf32> to vector<32xf32>
    %41 = vector.shape_cast %40 : vector<32xf32> to vector<1x1x32xf32>
    %42 = vector.broadcast %38 : vector<8x20x1xf32> to vector<8x20x32xf32>
    %43 = vector.broadcast %41 : vector<1x1x32xf32> to vector<8x20x32xf32>
    %44 = arith.mulf %42, %43 : vector<8x20x32xf32>
    %45 = arith.addf %36, %44 : vector<8x20x32xf32>
    %46 = vector.extract_strided_slice %45 {offsets = [0, 0, 0], sizes = [8, 16, 32], strides = [1, 1, 1]} : vector<8x20x32xf32> to vector<8x16x32xf32>
    %47 = vector.extract_strided_slice %45 {offsets = [0, 1, 0], sizes = [8, 16, 32], strides = [1, 1, 1]} : vector<8x20x32xf32> to vector<8x16x32xf32>
    %48 = vector.extract_strided_slice %45 {offsets = [0, 2, 0], sizes = [8, 16, 32], strides = [1, 1, 1]} : vector<8x20x32xf32> to vector<8x16x32xf32>
    %49 = vector.extract_strided_slice %45 {offsets = [0, 3, 0], sizes = [8, 16, 32], strides = [1, 1, 1]} : vector<8x20x32xf32> to vector<8x16x32xf32>
    %50 = vector.extract_strided_slice %45 {offsets = [0, 4, 0], sizes = [8, 16, 32], strides = [1, 1, 1]} : vector<8x20x32xf32> to vector<8x16x32xf32>
    %51 = tpu.concatenate %46, %47, %48, %49, %50 in 2 : vector<8x16x32xf32>, vector<8x16x32xf32>, vector<8x16x32xf32>, vector<8x16x32xf32>, vector<8x16x32xf32> -> vector<8x16x160xf32>
    %52 = vector.shape_cast %51 : vector<8x16x160xf32> to vector<128x160xf32>
    %c0_3 = arith.constant 0 : index
    %c0_4 = arith.constant 0 : index
    %53 = vector.load %arg3[%c0_3, %c0_4] : memref<160x64xf32, #tpu.memory_space<vmem>>, vector<160x64xf32>
    %cst = arith.constant dense<0.000000e+00> : vector<128x64xf32>
    %54 = tpu.matmul %52, %53, %cst {dimension_numbers = #tpu.dot_dimension_numbers<[1], [0], [0], [1], [0, 0, 1, 1], [], []>} : vector<128x160xf32>, vector<160x64xf32>, vector<128x64xf32> -> vector<128x64xf32>
    %c0_5 = arith.constant 0 : index
    %c0_6 = arith.constant 0 : index
    %55 = vector.load %arg4[%c0_5, %c0_6] : memref<1x64xf32, #tpu.memory_space<vmem>>, vector<1x64xf32>
    %56 = vector.broadcast %55 : vector<1x64xf32> to vector<128x64xf32>
    %57 = arith.addf %54, %56 : vector<128x64xf32>
    %cst_7 = arith.constant 0.000000e+00 : f32
    %58 = vector.broadcast %cst_7 : f32 to vector<128x64xf32>
    %59 = arith.maximumf %57, %58 : vector<128x64xf32>
    %60 = vector.shape_cast %59 : vector<128x64xf32> to vector<8x16x64xf32>
    %61 = vector.extract_strided_slice %60 {offsets = [0, 0, 0], sizes = [8, 15, 64], strides = [1, 1, 1]} : vector<8x16x64xf32> to vector<8x15x64xf32>
    %62 = vector.extract_strided_slice %60 {offsets = [0, 1, 0], sizes = [8, 15, 64], strides = [1, 1, 1]} : vector<8x16x64xf32> to vector<8x15x64xf32>
    %63 = arith.maximumf %61, %62 : vector<8x15x64xf32>
    %c0_8 = arith.constant 0 : index
    %c0_9 = arith.constant 0 : index
    %64 = vector.load %arg5[%c0_8, %c0_9] : memref<64x512xf32, #tpu.memory_space<vmem>>, vector<64x512xf32>
    %cst_10 = arith.constant 0.000000e+00 : f32
    %65 = vector.broadcast %cst_10 : f32 to vector<8x512xf32>
    %66 = vector.extract_strided_slice %63 {offsets = [0, 0, 0], sizes = [8, 1, 64], strides = [1, 1, 1]} : vector<8x15x64xf32> to vector<8x1x64xf32>
    %67 = vector.shape_cast %66 : vector<8x1x64xf32> to vector<8x64xf32>
    %cst_11 = arith.constant dense<0.000000e+00> : vector<8x512xf32>
    %68 = tpu.matmul %67, %64, %cst_11 {dimension_numbers = #tpu.dot_dimension_numbers<[1], [0], [0], [1], [0, 0, 1, 1], [], []>} : vector<8x64xf32>, vector<64x512xf32>, vector<8x512xf32> -> vector<8x512xf32>
    %69 = arith.addf %65, %68 : vector<8x512xf32>
    %70 = vector.extract_strided_slice %63 {offsets = [0, 2, 0], sizes = [8, 1, 64], strides = [1, 1, 1]} : vector<8x15x64xf32> to vector<8x1x64xf32>
    %71 = vector.shape_cast %70 : vector<8x1x64xf32> to vector<8x64xf32>
    %cst_12 = arith.constant dense<0.000000e+00> : vector<8x512xf32>
    %72 = tpu.matmul %71, %64, %cst_12 {dimension_numbers = #tpu.dot_dimension_numbers<[1], [0], [0], [1], [0, 0, 1, 1], [], []>} : vector<8x64xf32>, vector<64x512xf32>, vector<8x512xf32> -> vector<8x512xf32>
    %73 = vector.extract_strided_slice %72 {offsets = [0, 511], sizes = [8, 1], strides = [1, 1]} : vector<8x512xf32> to vector<8x1xf32>
    %74 = vector.extract_strided_slice %72 {offsets = [0, 0], sizes = [8, 511], strides = [1, 1]} : vector<8x512xf32> to vector<8x511xf32>
    %75 = tpu.concatenate %73, %74 in 1 : vector<8x1xf32>, vector<8x511xf32> -> vector<8x512xf32>
    %76 = arith.addf %69, %75 : vector<8x512xf32>
    %77 = vector.extract_strided_slice %63 {offsets = [0, 4, 0], sizes = [8, 1, 64], strides = [1, 1, 1]} : vector<8x15x64xf32> to vector<8x1x64xf32>
    %78 = vector.shape_cast %77 : vector<8x1x64xf32> to vector<8x64xf32>
    %cst_13 = arith.constant dense<0.000000e+00> : vector<8x512xf32>
    %79 = tpu.matmul %78, %64, %cst_13 {dimension_numbers = #tpu.dot_dimension_numbers<[1], [0], [0], [1], [0, 0, 1, 1], [], []>} : vector<8x64xf32>, vector<64x512xf32>, vector<8x512xf32> -> vector<8x512xf32>
    %80 = vector.extract_strided_slice %79 {offsets = [0, 510], sizes = [8, 2], strides = [1, 1]} : vector<8x512xf32> to vector<8x2xf32>
    %81 = vector.extract_strided_slice %79 {offsets = [0, 0], sizes = [8, 510], strides = [1, 1]} : vector<8x512xf32> to vector<8x510xf32>
    %82 = tpu.concatenate %80, %81 in 1 : vector<8x2xf32>, vector<8x510xf32> -> vector<8x512xf32>
    %83 = arith.addf %76, %82 : vector<8x512xf32>
    %84 = vector.extract_strided_slice %63 {offsets = [0, 6, 0], sizes = [8, 1, 64], strides = [1, 1, 1]} : vector<8x15x64xf32> to vector<8x1x64xf32>
    %85 = vector.shape_cast %84 : vector<8x1x64xf32> to vector<8x64xf32>
    %cst_14 = arith.constant dense<0.000000e+00> : vector<8x512xf32>
    %86 = tpu.matmul %85, %64, %cst_14 {dimension_numbers = #tpu.dot_dimension_numbers<[1], [0], [0], [1], [0, 0, 1, 1], [], []>} : vector<8x64xf32>, vector<64x512xf32>, vector<8x512xf32> -> vector<8x512xf32>
    %87 = vector.extract_strided_slice %86 {offsets = [0, 509], sizes = [8, 3], strides = [1, 1]} : vector<8x512xf32> to vector<8x3xf32>
    %88 = vector.extract_strided_slice %86 {offsets = [0, 0], sizes = [8, 509], strides = [1, 1]} : vector<8x512xf32> to vector<8x509xf32>
    %89 = tpu.concatenate %87, %88 in 1 : vector<8x3xf32>, vector<8x509xf32> -> vector<8x512xf32>
    %90 = arith.addf %83, %89 : vector<8x512xf32>
    %91 = vector.extract_strided_slice %63 {offsets = [0, 8, 0], sizes = [8, 1, 64], strides = [1, 1, 1]} : vector<8x15x64xf32> to vector<8x1x64xf32>
    %92 = vector.shape_cast %91 : vector<8x1x64xf32> to vector<8x64xf32>
    %cst_15 = arith.constant dense<0.000000e+00> : vector<8x512xf32>
    %93 = tpu.matmul %92, %64, %cst_15 {dimension_numbers = #tpu.dot_dimension_numbers<[1], [0], [0], [1], [0, 0, 1, 1], [], []>} : vector<8x64xf32>, vector<64x512xf32>, vector<8x512xf32> -> vector<8x512xf32>
    %94 = vector.extract_strided_slice %93 {offsets = [0, 508], sizes = [8, 4], strides = [1, 1]} : vector<8x512xf32> to vector<8x4xf32>
    %95 = vector.extract_strided_slice %93 {offsets = [0, 0], sizes = [8, 508], strides = [1, 1]} : vector<8x512xf32> to vector<8x508xf32>
    %96 = tpu.concatenate %94, %95 in 1 : vector<8x4xf32>, vector<8x508xf32> -> vector<8x512xf32>
    %97 = arith.addf %90, %96 : vector<8x512xf32>
    %98 = vector.extract_strided_slice %63 {offsets = [0, 10, 0], sizes = [8, 1, 64], strides = [1, 1, 1]} : vector<8x15x64xf32> to vector<8x1x64xf32>
    %99 = vector.shape_cast %98 : vector<8x1x64xf32> to vector<8x64xf32>
    %cst_16 = arith.constant dense<0.000000e+00> : vector<8x512xf32>
    %100 = tpu.matmul %99, %64, %cst_16 {dimension_numbers = #tpu.dot_dimension_numbers<[1], [0], [0], [1], [0, 0, 1, 1], [], []>} : vector<8x64xf32>, vector<64x512xf32>, vector<8x512xf32> -> vector<8x512xf32>
    %101 = vector.extract_strided_slice %100 {offsets = [0, 507], sizes = [8, 5], strides = [1, 1]} : vector<8x512xf32> to vector<8x5xf32>
    %102 = vector.extract_strided_slice %100 {offsets = [0, 0], sizes = [8, 507], strides = [1, 1]} : vector<8x512xf32> to vector<8x507xf32>
    %103 = tpu.concatenate %101, %102 in 1 : vector<8x5xf32>, vector<8x507xf32> -> vector<8x512xf32>
    %104 = arith.addf %97, %103 : vector<8x512xf32>
    %105 = vector.extract_strided_slice %63 {offsets = [0, 12, 0], sizes = [8, 1, 64], strides = [1, 1, 1]} : vector<8x15x64xf32> to vector<8x1x64xf32>
    %106 = vector.shape_cast %105 : vector<8x1x64xf32> to vector<8x64xf32>
    %cst_17 = arith.constant dense<0.000000e+00> : vector<8x512xf32>
    %107 = tpu.matmul %106, %64, %cst_17 {dimension_numbers = #tpu.dot_dimension_numbers<[1], [0], [0], [1], [0, 0, 1, 1], [], []>} : vector<8x64xf32>, vector<64x512xf32>, vector<8x512xf32> -> vector<8x512xf32>
    %108 = vector.extract_strided_slice %107 {offsets = [0, 506], sizes = [8, 6], strides = [1, 1]} : vector<8x512xf32> to vector<8x6xf32>
    %109 = vector.extract_strided_slice %107 {offsets = [0, 0], sizes = [8, 506], strides = [1, 1]} : vector<8x512xf32> to vector<8x506xf32>
    %110 = tpu.concatenate %108, %109 in 1 : vector<8x6xf32>, vector<8x506xf32> -> vector<8x512xf32>
    %111 = arith.addf %104, %110 : vector<8x512xf32>
    %112 = vector.extract_strided_slice %63 {offsets = [0, 14, 0], sizes = [8, 1, 64], strides = [1, 1, 1]} : vector<8x15x64xf32> to vector<8x1x64xf32>
    %113 = vector.shape_cast %112 : vector<8x1x64xf32> to vector<8x64xf32>
    %cst_18 = arith.constant dense<0.000000e+00> : vector<8x512xf32>
    %114 = tpu.matmul %113, %64, %cst_18 {dimension_numbers = #tpu.dot_dimension_numbers<[1], [0], [0], [1], [0, 0, 1, 1], [], []>} : vector<8x64xf32>, vector<64x512xf32>, vector<8x512xf32> -> vector<8x512xf32>
    %115 = vector.extract_strided_slice %114 {offsets = [0, 505], sizes = [8, 7], strides = [1, 1]} : vector<8x512xf32> to vector<8x7xf32>
    %116 = vector.extract_strided_slice %114 {offsets = [0, 0], sizes = [8, 505], strides = [1, 1]} : vector<8x512xf32> to vector<8x505xf32>
    %117 = tpu.concatenate %115, %116 in 1 : vector<8x7xf32>, vector<8x505xf32> -> vector<8x512xf32>
    %118 = arith.addf %111, %117 : vector<8x512xf32>
    %c0_19 = arith.constant 0 : index
    %c0_20 = arith.constant 0 : index
    %119 = vector.load %arg6[%c0_19, %c0_20] : memref<8x512xf32, #tpu.memory_space<vmem>>, vector<8x512xf32>
    tpu.vector_store %arg6[%c0_19, %c0_20], %118 {strides = array<i32>} : memref<8x512xf32, #tpu.memory_space<vmem>>, vector<8x512xf32>,
    return
  }
  func.func @transform_0(%arg0: i32) -> (i32, i32) {
    %c0_i32 = arith.constant 0 : i32
    %c0_i32_0 = arith.constant 0 : i32
    return %arg0, %c0_i32 : i32, i32
  }
  func.func @transform_1(%arg0: i32) -> (i32, i32) {
    %c0_i32 = arith.constant 0 : i32
    %c0_i32_0 = arith.constant 0 : i32
    %c0_i32_1 = arith.constant 0 : i32
    return %c0_i32, %c0_i32_0 : i32, i32
  }
  func.func @transform_2(%arg0: i32) -> (i32, i32) {
    %c0_i32 = arith.constant 0 : i32
    %c0_i32_0 = arith.constant 0 : i32
    %c0_i32_1 = arith.constant 0 : i32
    return %c0_i32, %c0_i32_0 : i32, i32
  }
  func.func @transform_3(%arg0: i32) -> (i32, i32) {
    %c0_i32 = arith.constant 0 : i32
    %c0_i32_0 = arith.constant 0 : i32
    %c0_i32_1 = arith.constant 0 : i32
    return %c0_i32, %c0_i32_0 : i32, i32
  }
  func.func @transform_4(%arg0: i32) -> (i32, i32) {
    %c0_i32 = arith.constant 0 : i32
    %c0_i32_0 = arith.constant 0 : i32
    %c0_i32_1 = arith.constant 0 : i32
    return %c0_i32, %c0_i32_0 : i32, i32
  }
  func.func @transform_5(%arg0: i32) -> (i32, i32) {
    %c0_i32 = arith.constant 0 : i32
    %c0_i32_0 = arith.constant 0 : i32
    return %arg0, %c0_i32 : i32, i32
  }
}

</mosaic_0001>

<bundles_post_ra>
// kernel: tpu_custom_call.1
= control target key start
LH: loop header
LB: loop body
LE: loop exit
PB: predicated region body
PF: predicated region fallthrough
CT: control target
= control target key end

     0   :  { %v24_v0 = vlaneseq  ;;  %s4724_s0 = inlined_call_operand.vmem [shape: f32[8,24], index: 0, kind: input, shape index: {}]   ;;  %s4725_s1 = inlined_call_operand.vmem [shape: f32[5,32], index: 1, kind: input, shape index: {}]   ;;  %s4726_s2 = inlined_call_operand.vmem [shape: f32[160,64], index: 2, kind: input, shape index: {}]   ;;  %s4727_s3 = inlined_call_operand.vmem [shape: f32[1,64], index: 3, kind: input, shape index: {}]   ;;  %s4728_s4 = inlined_call_operand.vmem [shape: f32[64,512], index: 4, kind: input, shape index: {}]   ;;  %s4729_s5 = inlined_call_operand.hbm [shape: f32[8,512], index: 5, kind: output, shape index: {}]  }
   0x1   :  { %10 = vsyncpa [#allocation3], 0  ;;  %v21_v3 = vld [vmem:[%s4724_s0] sm:$0xff]  ;;  %vm1263_vm0 = vcmask 1043456   ;;  %vm1304_vm1 = vcmask 261120   ;;  %vm1174_vm2 = vcmask 1044480  }
   0x2   :  { %v2964_v1 = vshrl.u32 %v24_v0, 7  ;;  %v2971_v4 = vperm.slane %v21_v3, 1  ;;  %v2973_v5 = vperm.slane %v21_v3, 0  ;;  %v2979_v7 = vperm.slane %v21_v3, 4  ;;  %v3203_v0 = vld [vmem:[%s4725_s1] sm:$0x1f] }
   0x3   :  { %v2987_v8 = vperm.slane %v21_v3, 2  ;;  %v2989_v9 = vperm.slane %v21_v3, 6  ;;  %v2994_v10 = vperm.slane %v21_v3, 3  ;;  %v3000_v11 = vperm.slane %v21_v3, 7  ;;  %s2923_s28 = smov 96   ;;  %s2924_s29 = smov 64  }
   0x4   :  { %2710 = vset.pattern.permute.xlu1 %v2964_v1  ;;  %v32_v2 = vadd.s32 8, %v2964_v1  ;;  %v38_v6 = vadd.s32 16, %v2964_v1  ;;  %v3005_v12 = vperm.slane %v21_v3, 5  ;;  %v3008_v13 = vadd.s32 1, %v2964_v1  ;;  %s2925_s30 = smov 32   ;;  %s2927_s20 = smov 4  }
   0x5   :  { %4744 = vst [vmem:[#allocation5_spill] sm:$0xff] %v2989_v9  ;;  %v3015_v14 = vadd.s32 17, %v2964_v1  ;;  %v3024_v15 = vadd.s32 9, %v2964_v1  ;;  %v3035_v16 = vadd.s32 18, %v2964_v1  ;;  %v3044_v17 = vadd.s32 4, %v2964_v1  ;;  %s2928_s1 = smov 1  }
   0x6   :  { %2713 = vset.pattern.permute.xlu2 %v32_v2  ;;  %2709 = vset.pattern.permute.xlu0 %v32_v2  ;;  %4745 = vst [vmem:[#allocation6_spill] sm:$0xff] %v3000_v11  ;;  %v3053_v18 = vadd.s32 3, %v2964_v1  ;;  %v3064_v20 = vadd.s32 19, %v2964_v1  ;;  %v3077_v23 = vadd.s32 11, %v2964_v1  ;;  %v3097_v28 = vadd.s32 2, %v2964_v1  ;;  %s2929_s21 = smov 6  }
   0x7   :  { %v3122_v35 = vadd.s32 10, %v2964_v1  ;;  %v3173_v53 = vadd.s32 12, %v2964_v1  ;;  %v3190_v60 = vadd.s32 20, %v2964_v1  ;;  %v3213_v3 = vperm.slane %v3203_v0, 1  ;;  %s2930_s22 = smov 7   ;;  %s2931_s23 = smov 2  }
   0x8   :  { %vm1085_vm3 = vcmask 1045504   ;;  %vm996_vm4 = vcmask 1046528   ;;  %vm1321_vm5 = vcmask 523264   ;;  %vm1338_vm6 = vcmask 785408   ;;  %s2932_s24 = smov 3   ;;  %s2933_s25 = smov [#allocation2]  }
   0x9   :  { %vm1671_vm7 = vcmask 1041409   ;;  %vm1673_vm8 = vcmask 1042434   ;;  %vm1676_vm9 = vcmask 1043459   ;;  %vm1679_vm10 = vcmask 1044484   ;;  %s2639_s26 = sshll.u32 %s2933_s25, 4  ;;  %s2641_s7 = sshll.u32 %s4729_s5, 4  ;;  %s2640_s26 = int_to_ptr.vmem [resolvable:$true] %s2639_s26  ;;  %s2642_s7 = int_to_ptr.hbm [resolvable:$true] %s2641_s7 }
   0xa   :  { %vm1682_vm11 = vcmask 1045509   ;;  %vm1685_vm12 = vcmask 1046534   ;;  %vm1688_vm13 = vcmask 1047559   ;;  %vm1785_vm14 = vcmask 7168  }
   0xb   :  { %vm1999_vm15 = vcmask 15360  }
   0xc   :  { %47 = vperm.xlu1 %2710, %v2971_v4  }
   0xe   :  { %53 = vperm.xlu2 %2713, %v2971_v4   ;;  %34 = vperm.xlu0 %2709, %v2973_v5  }
  0x14   :  { %2711 = vset.pattern.permute.xlu1 %v38_v6 }
  0x16   :  { %2714 = vset.pattern.permute.xlu2 %v38_v6  ;;  %110 = vperm.xlu0 %2709, %v2979_v7  }
  0x1c   :  { %40 = vperm.xlu1 %2711, %v2973_v5  }
  0x1e   :  { %59 = vperm.xlu2 %2714, %v2971_v4   ;;  %2718 = vset.pattern.permute.xlu0 %v2964_v1 }
  0x24   :  { %2712 = vset.pattern.permute.xlu1 %v2964_v1 }
  0x26   :  { %2715 = vset.pattern.permute.xlu2 %v32_v2  ;;  %28 = vperm.xlu0 %2718, %v2973_v5  }
  0x2c   :  { %66 = vperm.xlu1 %2712, %v2987_v8  }
  0x2e   :  { %72 = vperm.xlu2 %2715, %v2987_v8   ;;  %142 = vperm.xlu0 %2718, %v2989_v9  }
  0x34   :  { %85 = vperm.xlu1 %2712, %v2994_v10  }
  0x36   :  { %91 = vperm.xlu2 %2715, %v2994_v10   ;;  %2721 = vset.pattern.permute.xlu0 %v38_v6 }
  0x3c   :  { %2716 = vset.pattern.permute.xlu1 %v38_v6 }
  0x3e   :  { %2717 = vset.pattern.permute.xlu2 %v2964_v1  ;;  %78 = vperm.xlu0 %2721, %v2987_v8  }
  0x44   :  { %97 = vperm.xlu1 %2716, %v2994_v10  }
  0x46   :  { %104 = vperm.xlu2 %2717, %v2979_v7   ;;  %173 = vperm.xlu0 %2721, %v3000_v11  }
  0x4c   :  { %116 = vperm.xlu1 %2716, %v2979_v7  }
  0x4e   :  { %123 = vperm.xlu2 %2717, %v3005_v12   ;;  %2730 = vset.pattern.permute.xlu0 %v3008_v13 }
  0x54   :  { %2719 = vset.pattern.permute.xlu1 %v32_v2 }
  0x56   :  { %2720 = vset.pattern.permute.xlu2 %v38_v6  ;;  %258 = vperm.xlu0 %2730, %v2994_v10  }
  0x5c   :  { %129 = vperm.xlu1 %2719, %v3005_v12  }
  0x5e   :  { %135 = vperm.xlu2 %2720, %v3005_v12   ;;  %2733 = vset.pattern.permute.xlu0 %v3015_v14 }
  0x64   :  { %148 = vperm.xlu1 %2719, %v2989_v9  }
  0x66   :  { %154 = vperm.xlu2 %2720, %v2989_v9   ;;  %288 = vperm.xlu0 %2733, %v2979_v7  }
  0x68   :  { %v3058_v19 = vpop.permute.xlu2 %53 }
  0x6c   :  { %2722 = vset.pattern.permute.xlu1 %v2964_v1  ;;  %v3210_v1 = vperm.slane %v3203_v0, 0 }
  0x6e   :  { %2723 = vset.pattern.permute.xlu2 %v32_v2  ;;  %2734 = vset.pattern.permute.xlu0 %v3024_v15 }
  0x74   :  { %161 = vperm.xlu1 %2722, %v3000_v11  }
  0x76   :  { %167 = vperm.xlu2 %2723, %v3000_v11   ;;  %228 = vperm.xlu0 %2734, %v2971_v4  }
  0x78   :  { %v3066_v21 = vpop.permute.xlu2 %59 }
  0x7c   :  { %2724 = vset.pattern.permute.xlu1 %v3008_v13 }
  0x7e   :  { %2725 = vset.pattern.permute.xlu2 %v3024_v15  ;;  %318 = vperm.xlu0 %2734, %v2989_v9   ;;  %v3092_v26 = vpop.permute.xlu1 %47 }
  0x80   :  { %v3136_v40 = vpop.permute.xlu0 %34 }
  0x84   :  { %204 = vperm.xlu1 %2724, %v2973_v5  }
  0x86   :  { %210 = vperm.xlu2 %2725, %v2973_v5   ;;  %2743 = vset.pattern.permute.xlu0 %v3035_v16 }
  0x88   :  { %v3072_v22 = vpop.permute.xlu2 %72  ;;  %v3144_v43 = vpop.permute.xlu0 %110 }
  0x89   :  { %4754 = vst [vmem:[#allocation15_spill] sm:$0xff] %v3144_v43 }
  0x8c   :  { %2726 = vset.pattern.permute.xlu1 %v3015_v14 }
  0x8e   :  { %2727 = vset.pattern.permute.xlu2 %v3008_v13  ;;  %427 = vperm.xlu0 %2743, %v2971_v4   ;;  %v3102_v29 = vpop.permute.xlu1 %40 }
  0x90   :  { %v3082_v24 = vpop.permute.xlu2 %91 }
  0x94   :  { %216 = vperm.xlu1 %2726, %v2973_v5  }
  0x96   :  { %222 = vperm.xlu2 %2727, %v2971_v4   ;;  %2746 = vset.pattern.permute.xlu0 %v3044_v17 }
  0x98   :  { %v3153_v46 = vpop.permute.xlu0 %28 }
  0x9c   :  { %234 = vperm.xlu1 %2726, %v2971_v4  }
  0x9e   :  { %240 = vperm.xlu2 %2727, %v2987_v8   ;;  %783 = vperm.xlu0 %2746, %v2973_v5   ;;  %v3109_v31 = vpop.permute.xlu1 %66 }
  0xa0   :  { %v3087_v25 = vpop.permute.xlu2 %104  ;;  %v3164_v50 = vpop.permute.xlu0 %142 }
  0xa1   :  { %4746 = vst [vmem:[#allocation7_spill] sm:$0xff] %v3087_v25  ;;  %v3306_v25 = vperm.slane %v3203_v0, 4 }
  0xa2   :  { %4758 = vst [vmem:[#allocation19_spill] sm:$0xff] %v3164_v50  ;;  %v3259_v50 = vperm.slane %v3203_v0, 2 }
  0xa4   :  { %2728 = vset.pattern.permute.xlu1 %v3024_v15 }
  0xa6   :  { %2729 = vset.pattern.permute.xlu2 %v3015_v14  ;;  %2755 = vset.pattern.permute.xlu0 %v3053_v18  ;;  %v3115_v33 = vpop.permute.xlu1 %85 }
  0xa8   :  { %v3094_v27 = vpop.permute.xlu2 %123 }
  0xa9   :  { %4747 = vst [vmem:[#allocation8_spill] sm:$0xff] %v3094_v27  ;;  %v1374_v27 = vld [vmem:[%s4726_s2 + $0x98] sm:$0xff] }
  0xaa   :  { %1488 = vmatpush.msra.mxu1 %v1374_v27 }
  0xac   :  { %246 = vperm.xlu1 %2728, %v2987_v8  }
  0xae   :  { %252 = vperm.xlu2 %2729, %v2987_v8   ;;  %626 = vperm.xlu0 %2755, %v2987_v8  }
  0xb0   :  { %v3175_v54 = vpop.permute.xlu0 %78 }
  0xb4   :  { %264 = vperm.xlu1 %2728, %v2994_v10  }
  0xb6   :  { %270 = vperm.xlu2 %2729, %v2994_v10   ;;  %2760 = vset.pattern.permute.xlu0 %v3064_v20  ;;  %v3124_v36 = vpop.permute.xlu1 %97 }
  0xb7   :  { %4751 = vst [vmem:[#allocation12_spill] sm:$0xff] %v3124_v36 }
  0xb8   :  { %v3104_v30 = vpop.permute.xlu2 %135  ;;  %v174_v57 = vpop.permute.xlu0 %173 }
  0xb9   :  { %4748 = vst [vmem:[#allocation9_spill] sm:$0xff] %v3104_v30 }
  0xbc   :  { %2731 = vset.pattern.permute.xlu1 %v3008_v13 }
  0xbe   :  { %2732 = vset.pattern.permute.xlu2 %v3024_v15  ;;  %638 = vperm.xlu0 %2760, %v2987_v8   ;;  %v3130_v38 = vpop.permute.xlu1 %116 }
  0xbf   :  { %4752 = vst [vmem:[#allocation13_spill] sm:$0xff] %v3130_v38  ;;  %v1372_v38 = vld [vmem:[%s4726_s2 + $0x88] sm:$0xff] }
  0xc0   :  { %v3111_v32 = vpop.permute.xlu2 %154 }
  0xc1   :  { %4749 = vst [vmem:[#allocation10_spill] sm:$0xff] %v3111_v32 }
  0xc4   :  { %276 = vperm.xlu1 %2731, %v2979_v7  }
  0xc6   :  { %282 = vperm.xlu2 %2732, %v2979_v7   ;;  %2761 = vset.pattern.permute.xlu0 %v3077_v23 }
  0xc8   :  { %v3193_v61 = vpop.permute.xlu0 %258 }
  0xcc   :  { %294 = vperm.xlu1 %2731, %v3005_v12  }
  0xce   :  { %300 = vperm.xlu2 %2732, %v3005_v12   ;;  %614 = vperm.xlu0 %2761, %v2971_v4   ;;  %v3138_v41 = vpop.permute.xlu1 %129 }
  0xcf   :  { %4753 = vst [vmem:[#allocation14_spill] sm:$0xff] %v3138_v41 }
  0xd0   :  { %v3118_v34 = vpop.permute.xlu2 %167 }
  0xd1   :  { %4750 = vst [vmem:[#allocation11_spill] sm:$0xff] %v3118_v34 }
  0xd4   :  { %2735 = vset.pattern.permute.xlu1 %v3015_v14 }
  0xd6   :  { %2736 = vset.pattern.permute.xlu2 %v3008_v13  ;;  %650 = vperm.xlu0 %2761, %v2994_v10   ;;  %v3147_v44 = vpop.permute.xlu1 %148  ;;  %v199_v13 = vmul.f32 %v3210_v1, %v174_v57 }
  0xd7   :  { %4755 = vst [vmem:[#allocation16_spill] sm:$0xff] %v3147_v44 }
  0xd8   :  { %v3206_v2 = vpop.permute.xlu0 %288 }
  0xd9   :  { %4763 = vst [vmem:[#allocation24_spill] sm:$0xff] %v3206_v2 }
  0xdc   :  { %306 = vperm.xlu1 %2735, %v3005_v12  }
  0xde   :  { %312 = vperm.xlu2 %2736, %v2989_v9   ;;  %2766 = vset.pattern.permute.xlu0 %v3097_v28 }
  0xe0   :  { %v3128_v37 = vpop.permute.xlu2 %210 }
  0xe4   :  { %324 = vperm.xlu1 %2735, %v2989_v9  }
  0xe6   :  { %330 = vperm.xlu2 %2736, %v3000_v11   ;;  %397 = vperm.xlu0 %2766, %v2973_v5   ;;  %v3155_v47 = vpop.permute.xlu1 %161 }
  0xe7   :  { %4756 = vst [vmem:[#allocation17_spill] sm:$0xff] %v3155_v47 }
  0xec   :  { %2737 = vset.pattern.permute.xlu1 %v3024_v15 }
  0xee   :  { %2738 = vset.pattern.permute.xlu2 %v3015_v14 }
  0xf0   :  { %v3134_v39 = vpop.permute.xlu2 %222 }
  0xf4   :  { %336 = vperm.xlu1 %2737, %v3000_v11  }
  0xf6   :  { %342 = vperm.xlu2 %2738, %v3000_v11   ;;  %v3161_v49 = vpop.permute.xlu1 %204 }
  0xf8   :  { %v3142_v42 = vpop.permute.xlu2 %240 }
  0xfc   :  { %2739 = vset.pattern.permute.xlu1 %v3122_v35 }
  0xfe   :  { %2740 = vset.pattern.permute.xlu2 %v3035_v16 }
 0x104   :  { %403 = vperm.xlu1 %2739, %v2973_v5  }
 0x106   :  { %409 = vperm.xlu2 %2740, %v2973_v5   ;;  %v3169_v52 = vpop.permute.xlu1 %216 }
 0x108   :  { %v3150_v45 = vpop.permute.xlu2 %252 }
 0x10c   :  { %2741 = vset.pattern.permute.xlu1 %v3097_v28 }
 0x10e   :  { %2742 = vset.pattern.permute.xlu2 %v3122_v35  ;;  %v3181_v56 = vpop.permute.xlu1 %234 }
 0x110   :  { %v3158_v48 = vpop.permute.xlu2 %270 }
 0x111   :  { %4757 = vst [vmem:[#allocation18_spill] sm:$0xff] %v3158_v48 }
 0x114   :  { %415 = vperm.xlu1 %2741, %v2971_v4  }
 0x116   :  { %421 = vperm.xlu2 %2742, %v2971_v4  }
 0x11c   :  { %433 = vperm.xlu1 %2741, %v2987_v8  }
 0x11e   :  { %439 = vperm.xlu2 %2742, %v2987_v8   ;;  %v3187_v59 = vpop.permute.xlu1 %246 }
 0x120   :  { %v3166_v51 = vpop.permute.xlu2 %282 }
 0x121   :  { %4759 = vst [vmem:[#allocation20_spill] sm:$0xff] %v3166_v51 }
 0x124   :  { %2744 = vset.pattern.permute.xlu1 %v3053_v18 }
 0x126   :  { %2745 = vset.pattern.permute.xlu2 %v3077_v23  ;;  %v3198_v63 = vpop.permute.xlu1 %264 }
 0x128   :  { %v3178_v55 = vpop.permute.xlu2 %300 }
 0x129   :  { %4760 = vst [vmem:[#allocation21_spill] sm:$0xff] %v3178_v55 }
 0x12c   :  { %590 = vperm.xlu1 %2744, %v2973_v5  }
 0x12e   :  { %596 = vperm.xlu2 %2745, %v2973_v5  }
 0x134   :  { %2747 = vset.pattern.permute.xlu1 %v3173_v53 }
 0x136   :  { %2748 = vset.pattern.permute.xlu2 %v3064_v20  ;;  %v3217_v15 = vpop.permute.xlu1 %276 }
 0x137   :  { %4764 = vst [vmem:[#allocation25_spill] sm:$0xff] %v3217_v15 }
 0x138   :  { %v3184_v58 = vpop.permute.xlu2 %312 }
 0x139   :  { %4761 = vst [vmem:[#allocation22_spill] sm:$0xff] %v3184_v58 }
 0x13c   :  { %789 = vperm.xlu1 %2747, %v2973_v5  }
 0x13e   :  { %602 = vperm.xlu2 %2748, %v2973_v5  }
 0x140   :  { %v3196_v62 = vpop.permute.xlu2 %330 }
 0x141   :  { %4762 = vst [vmem:[#allocation23_spill] sm:$0xff] %v3196_v62  ;;  %v3225_v62 = vpop.permute.xlu1 %294 }
 0x142   :  { %4766 = vst [vmem:[#allocation27_spill] sm:$0xff] %v3225_v62 }
 0x144   :  { %2749 = vset.pattern.permute.xlu1 %v3190_v60 }
 0x146   :  { %2750 = vset.pattern.permute.xlu2 %v3053_v18 }
 0x14c   :  { %795 = vperm.xlu1 %2749, %v2973_v5   ;;  %v3222_v5 = vpop.permute.xlu0 %228 }
 0x14e   :  { %608 = vperm.xlu2 %2750, %v2971_v4   ;;  %v3231_v57 = vpop.permute.xlu1 %306 }
 0x14f   :  { %4768 = vst [vmem:[#allocation29_spill] sm:$0xff] %v3231_v57 }
 0x150   :  { %v343_v6 = vpop.permute.xlu2 %342 }
 0x151   :  { %v368_v14 = vmul.f32 %v3213_v3, %v343_v6 }
 0x153   :  { %v3219_v47 = vadd.f32 %v368_v14, %v199_v13 }
 0x154   :  { %2751 = vset.pattern.permute.xlu1 %v3044_v17  ;;  %v3229_v34 = vpop.permute.xlu0 %318 }
 0x155   :  { %4765 = vst [vmem:[#allocation26_spill] sm:$0xff] %v3219_v47 }
 0x156   :  { %2752 = vset.pattern.permute.xlu2 %v3173_v53  ;;  %4767 = vst [vmem:[#allocation28_spill] sm:$0xff] %v3229_v34  ;;  %v3238_v13 = vpop.permute.xlu1 %324 }
 0x157   :  { %4769 = vst [vmem:[#allocation30_spill] sm:$0xff] %v3238_v13  ;;  %v351_v13 = vmul.f32 %v3213_v3, %v3142_v42  ;;  %v3268_v42 = vperm.slane %v3203_v0, 3 }
 0x15c   :  { %801 = vperm.xlu1 %2751, %v2971_v4   ;;  %v3235_v6 = vpop.permute.xlu0 %427 }
 0x15e   :  { %807 = vperm.xlu2 %2752, %v2971_v4  }
 0x160   :  { %v410_v30 = vpop.permute.xlu2 %409 }
 0x164   :  { %2753 = vset.pattern.permute.xlu1 %v3064_v20  ;;  %v784_v14 = vpop.permute.xlu0 %783 }
 0x166   :  { %2754 = vset.pattern.permute.xlu2 %v3190_v60  ;;  %v3242_v47 = vpop.permute.xlu1 %336 }
 0x167   :  { %4770 = vst [vmem:[#allocation31_spill] sm:$0xff] %v3242_v47  ;;  %v182_v47 = vmul.f32 %v3210_v1, %v3109_v31  ;;  %v1373_v31 = vld [vmem:[%s4726_s2 + $0x90] sm:$0xff] }
 0x168   :  { %1489 = vmatpush.msra.mxu1 %v1373_v31  ;;  %v346_v31 = vmul.f32 %v3213_v3, %v3128_v37 }
 0x169   :  { %v375_v62 = vadd.f32 %v351_v13, %v182_v47  ;;  %v1371_v47 = vld [vmem:[%s4726_s2 + $0x80] sm:$0xff] }
 0x16a   :  { %1490 = vmatpush.msra.mxu1 %v1372_v38  ;;  %v176_v38 = vmul.f32 %v3210_v1, %v3153_v46 }
 0x16c   :  { %620 = vperm.xlu1 %2753, %v2971_v4   ;;  %v627_v32 = vpop.permute.xlu0 %626  ;;  %1491 = vmatpush.msra.mxu1 %v1371_v47 }
 0x16d   :  { %v737_v55 = vmul.f32 %v3268_v42, %v627_v32 }
 0x16e   :  { %813 = vperm.xlu2 %2754, %v2971_v4  }
 0x170   :  { %v3284_v27 = vpop.permute.xlu2 %421 }
 0x174   :  { %2756 = vset.pattern.permute.xlu1 %v3077_v23  ;;  %v3247_v34 = vpop.permute.xlu0 %638 }
 0x176   :  { %2757 = vset.pattern.permute.xlu2 %v3044_v17  ;;  %v404_v44 = vpop.permute.xlu1 %403 }
 0x177   :  { %v539_v2 = vmul.f32 %v3259_v50, %v404_v44 }
 0x17c   :  { %632 = vperm.xlu1 %2756, %v2987_v8   ;;  %v3261_v58 = vpop.permute.xlu0 %614 }
 0x17e   :  { %819 = vperm.xlu2 %2757, %v2987_v8  }
 0x184   :  { %2758 = vset.pattern.permute.xlu1 %v3173_v53  ;;  %v3287_v32 = vpop.permute.xlu0 %650 }
 0x186   :  { %2759 = vset.pattern.permute.xlu2 %v3035_v16  ;;  %v3251_v4 = vpop.permute.xlu1 %415 }
 0x18c   :  { %825 = vperm.xlu1 %2758, %v2987_v8  }
 0x18e   :  { %445 = vperm.xlu2 %2759, %v2987_v8   ;;  %v434_v57 = vpop.permute.xlu1 %433 }
 0x18f   :  { %v544_v41 = vmul.f32 %v3259_v50, %v434_v57 }
 0x191   :  { %v568_v43 = vadd.f32 %v544_v41, %v375_v62  ;;  %v3291_v41 = vpop.permute.xlu2 %439  ;;  %v398_v62 = vpop.permute.xlu0 %397 }
 0x192   :  { %v538_v57 = vmul.f32 %v3259_v50, %v398_v62 }
 0x193   :  { %v3281_v13 = vadd.f32 %v737_v55, %v568_v43  ;;  %v345_v43 = vmul.f32 %v3213_v3, %v3161_v49 }
 0x194   :  { %2762 = vset.pattern.permute.xlu1 %v3190_v60 }
 0x195   :  { %v369_v47 = vadd.f32 %v345_v43, %v176_v38 }
 0x196   :  { %2763 = vset.pattern.permute.xlu2 %v3097_v28 }
 0x197   :  { %v562_v49 = vadd.f32 %v538_v57, %v369_v47 }
 0x199   :  { %v597_v46 = vpop.permute.xlu2 %596 }
 0x19a   :  { %v732_v62 = vmul.f32 %v3268_v42, %v597_v46 }
 0x19c   :  { %831 = vperm.xlu1 %2762, %v2987_v8   ;;  %v177_v8 = vmul.f32 %v3210_v1, %v3136_v40  ;;  %v924_v40 = vmul.f32 %v3306_v25, %v784_v14  ;;  %v540_v14 = vmul.f32 %v3259_v50, %v410_v30  ;;  %v349_v30 = vmul.f32 %v3213_v3, %v3222_v5 }
 0x19e   :  { %451 = vperm.xlu2 %2763, %v2994_v10   ;;  %v591_v55 = vpop.permute.xlu1 %590  ;;  %v370_v15 = vadd.f32 %v346_v31, %v177_v8 }
 0x19f   :  { %v731_v51 = vmul.f32 %v3268_v42, %v591_v55 }
 0x1a0   :  { %v563_v36 = vadd.f32 %v539_v2, %v370_v15  ;;  %v178_v15 = vmul.f32 %v3210_v1, %v3102_v29 }
 0x1a1   :  { %v755_v11 = vadd.f32 %v731_v51, %v562_v49 }
 0x1a2   :  { %v756_v38 = vadd.f32 %v732_v62, %v563_v36  ;;  %v603_v36 = vpop.permute.xlu2 %602  ;;  %v180_v62 = vmul.f32 %v3210_v1, %v3058_v19 }
 0x1a3   :  { %v3313_v43 = vadd.f32 %v924_v40, %v755_v11  ;;  %v347_v11 = vmul.f32 %v3213_v3, %v3169_v52  ;;  %v733_v8 = vmul.f32 %v3268_v42, %v603_v36 }
 0x1a4   :  { %2764 = vset.pattern.permute.xlu1 %v3122_v35 }
 0x1a5   :  { %v1264_v44 = vrot.slane %v3313_v43, 4  ;;  %v371_v57 = vadd.f32 %v347_v11, %v178_v15  ;;  %v997_v19 = vrot.slane %v3313_v43, 1 }
 0x1a6   :  { %2765 = vset.pattern.permute.xlu2 %v3053_v18 }
 0x1a7   :  { %v564_v31 = vadd.f32 %v540_v14, %v371_v57  ;;  %v542_v14 = vmul.f32 %v3259_v50, %v3284_v27  ;;  %v373_v27 = vadd.f32 %v349_v30, %v180_v62  ;;  %v541_v62 = vmul.f32 %v3259_v50, %v3251_v4 }
 0x1a9   :  { %v757_v46 = vadd.f32 %v733_v8, %v564_v31 }
 0x1aa   :  { %v609_v40 = vpop.permute.xlu2 %608 }
 0x1ac   :  { %457 = vperm.xlu1 %2764, %v2994_v10  }
 0x1ae   :  { %644 = vperm.xlu2 %2765, %v2994_v10   ;;  %v790_v37 = vpop.permute.xlu1 %789 }
 0x1af   :  { %v925_v0 = vmul.f32 %v3306_v25, %v790_v37 }
 0x1b1   :  { %v3316_v55 = vadd.f32 %v925_v0, %v756_v38  ;;  %v1175_v0 = vrot.slane %v3313_v43, 3 }
 0x1b3   :  { %v1265_v51 = vrot.slane %v3316_v55, 4  ;;  %v1176_v52 = vrot.slane %v3316_v55, 3  ;;  %v1087_v37 = vrot.slane %v3316_v55, 2  ;;  %v998_v29 = vrot.slane %v3316_v55, 1 }
 0x1b4   :  { %2777 = vset.pattern.permute.xlu1 %v3044_v17 }
 0x1b5   :  { %v1266_v2 = vsel %vm1263_vm0, %v1264_v44, %v1265_v51  ;;  %v1086_v44 = vrot.slane %v3313_v43, 2  ;;  %v1177_v57 = vsel %vm1174_vm2, %v1175_v0, %v1176_v52  ;;  %v999_v31 = vsel %vm996_vm4, %v997_v19, %v998_v29 }
 0x1b6   :  { %2650 = vmatmul.msk.f32.vlgmr.msra.gmra.mxu1 %vm1304_vm1, %v1266_v2  ;;  %2778 = vset.pattern.permute.xlu2 %v3173_v53  ;;  %v348_v0 = vmul.f32 %v3213_v3, %v3134_v39 }
 0x1b7   :  { %v1088_v8 = vsel %vm1085_vm3, %v1086_v44, %v1087_v37 }
 0x1b8   :  { %v808_v44 = vpop.permute.xlu2 %807 }
 0x1b9   :  { %v928_v30 = vmul.f32 %v3306_v25, %v808_v44 }
 0x1be   :  { %v796_v47 = vpop.permute.xlu1 %795 }
 0x1bf   :  { %v926_v49 = vmul.f32 %v3306_v25, %v796_v47 }
 0x1c1   :  { %v950_v38 = vadd.f32 %v926_v49, %v757_v46 }
 0x1c3   :  { %v1267_v2 = vrot.slane %v950_v38, 4  ;;  %v1178_v11 = vrot.slane %v950_v38, 3  ;;  %v1089_v36 = vrot.slane %v950_v38, 2  ;;  %v1000_v15 = vrot.slane %v950_v38, 1 }
 0x1c5   :  { %v1268_v5 = vsel %vm1263_vm0, %v1265_v51, %v1267_v2  ;;  %v1179_v47 = vsel %vm1174_vm2, %v1176_v52, %v1178_v11  ;;  %v1090_v46 = vsel %vm1085_vm3, %v1087_v37, %v1089_v36  ;;  %v1001_v49 = vsel %vm996_vm4, %v998_v29, %v1000_v15 }
 0x1c6   :  { %2651 = vmatmul.msk.f32.gmra.mxu1 %vm1304_vm1, %v1268_v5  ;;  %v2779_v38 = vpack.i.bf16 %v1179_v47, %v1177_v57  ;;  %v2772_v48 = vpack.i.bf16 %v1090_v46, %v1088_v8  ;;  %v2767_v9 = vpack.i.bf16 %v1001_v49, %v999_v31  ;;  %v179_v51 = vmul.f32 %v3210_v1, %v3092_v26 }
 0x1c7   :  { %v735_v52 = vmul.f32 %v3268_v42, %v3261_v58  ;;  %v566_v37 = vadd.f32 %v542_v14, %v373_v27  ;;  %v734_v29 = vmul.f32 %v3268_v42, %v609_v40  ;;  %v350_v14 = vmul.f32 %v3213_v3, %v3181_v56 }
 0x1c8   :  { %2780 = vrot.lane.b32.xlu0 %v2779_v38, %s2923_s28  ;;  %2773 = vrot.lane.b32.xlu2 %v2772_v48, %s2924_s29  ;;  %v372_v39 = vadd.f32 %v348_v0, %v179_v51  ;;  %v814_v15 = vpop.permute.xlu2 %813  ;;  %v181_v57 = vmul.f32 %v3210_v1, %v3066_v21  ;;  %v543_v31 = vmul.f32 %v3259_v50, %v3235_v6 }
 0x1c9   :  { %2768 = vrot.lane.b32.xlu1 %v2767_v9, %s2925_s30  ;;  %v759_v48 = vadd.f32 %v735_v52, %v566_v37  ;;  %v929_v46 = vmul.f32 %v3306_v25, %v814_v15  ;;  %v184_v0 = vmul.f32 %v3210_v1, %v3175_v54  ;;  %v353_v6 = vmul.f32 %v3213_v3, %v3150_v45 }
 0x1ca   :  { %v565_v19 = vadd.f32 %v541_v62, %v372_v39  ;;  %v374_v8 = vadd.f32 %v350_v14, %v181_v57 }
 0x1cb   :  { %v3364_v26 = vadd.f32 %v928_v30, %v759_v48  ;;  %v377_v30 = vadd.f32 %v353_v6, %v184_v0  ;;  %v1367_v0 = vld [vmem:[%s4726_s2 + $0x60] sm:$0xff] }
 0x1cc   :  { %v758_v11 = vadd.f32 %v734_v29, %v565_v19  ;;  %v567_v47 = vadd.f32 %v543_v31, %v374_v8  ;;  %v739_v19 = vmul.f32 %v3268_v42, %v3247_v34  ;;  %v545_v34 = vmul.f32 %v3259_v50, %v3291_v41 }
 0x1cd   :  { %v1270_v4 = vrot.slane %v3364_v26, 4  ;;  %v1003_v51 = vrot.slane %v3364_v26, 1 }
 0x1ce   :  { %v802_v2 = vpop.permute.xlu1 %801 }
 0x1cf   :  { %v927_v58 = vmul.f32 %v3306_v25, %v802_v2 }
 0x1d0   :  { %843 = vperm.xlu2 %2778, %v2994_v10  }
 0x1d1   :  { %v3368_v36 = vadd.f32 %v927_v58, %v758_v11  ;;  %837 = vperm.xlu1 %2777, %v2994_v10   ;;  %v352_v58 = vmul.f32 %v3213_v3, %v3187_v59 }
 0x1d3   :  { %v1269_v9 = vrot.slane %v3368_v36, 4  ;;  %v1002_v21 = vrot.slane %v3368_v36, 1 }
 0x1d5   :  { %v1271_v40 = vsel %vm1263_vm0, %v1269_v9, %v1270_v4  ;;  %v1004_v62 = vsel %vm996_vm4, %v1002_v21, %v1003_v51  ;;  %v183_v9 = vmul.f32 %v3210_v1, %v3072_v22 }
 0x1d6   :  { %2652 = vmatmul.msk.f32.gmra.mxu1 %vm1304_vm1, %v1271_v40 }
 0x1d8   :  { %2785 = vset.pattern.permute.xlu2 %v3064_v20  ;;  %v820_v38 = vpop.permute.xlu2 %819 }
 0x1d9   :  { %2784 = vset.pattern.permute.xlu1 %v3035_v16  ;;  %v930_v40 = vmul.f32 %v3306_v25, %v820_v38  ;;  %v1369_v38 = vld [vmem:[%s4726_s2 + $0x70] sm:$0xff] }
 0x1db   :  { %v3422_v59 = vadd.f32 %v930_v40, %v3281_v13  ;;  %v1091_v13 = vrot.slane %v3368_v36, 2 }
 0x1dd   :  { %v1096_v40 = vrot.slane %v3422_v59, 2 }
 0x1de   :  { %v621_v5 = vpop.permute.xlu1 %620 }
 0x1df   :  { %v736_v49 = vmul.f32 %v3268_v42, %v621_v5  ;;  %v1370_v5 = vld [vmem:[%s4726_s2 + $0x78] sm:$0xff] }
 0x1e0   :  { %656 = vperm.xlu2 %2785, %v2994_v10   ;;  %1411 = vmatpush.msra.mxu0 %v1370_v5 }
 0x1e1   :  { %v760_v56 = vadd.f32 %v736_v49, %v567_v47  ;;  %463 = vperm.xlu1 %2784, %v2994_v10   ;;  %v1092_v47 = vrot.slane %v3364_v26, 2 }
 0x1e2   :  { %1412 = vmatpush.msra.mxu0 %v1369_v38  ;;  %v1357_v38 = vld [vmem:[%s4726_s2 + $0x10] sm:$0xff] }
 0x1e3   :  { %v3387_v27 = vadd.f32 %v929_v46, %v760_v56  ;;  %v1274_v46 = vrot.slane %v3422_v59, 4  ;;  %v1368_v56 = vld [vmem:[%s4726_s2 + $0x68] sm:$0xff]  ;;  %v1093_v6 = vsel %vm1085_vm3, %v1091_v13, %v1092_v47 }
 0x1e4   :  { %1413 = vmatpush.msra.mxu0 %v1368_v56  ;;  %v1356_v56 = vld [vmem:[%s4726_s2 + $0x8] sm:$0xff] }
 0x1e5   :  { %v1272_v44 = vrot.slane %v3387_v27, 4  ;;  %v1005_v52 = vrot.slane %v3387_v27, 1  ;;  %v1094_v41 = vrot.slane %v3387_v27, 2 }
 0x1e6   :  { %1414 = vmatpush.msra.mxu0 %v1367_v0  ;;  %v1355_v0 = vld [vmem:[%s4726_s2] sm:$0xff] }
 0x1e7   :  { %v1273_v37 = vsel %vm1263_vm0, %v1270_v4, %v1272_v44  ;;  %v1006_v39 = vsel %vm996_vm4, %v1003_v51, %v1005_v52  ;;  %v376_v4 = vadd.f32 %v352_v58, %v183_v9  ;;  %v1095_v21 = vsel %vm1085_vm3, %v1092_v47, %v1094_v41  ;;  %v1366_v52 = vld [vmem:[%s4726_s2 + $0x58] sm:$0xff]  ;;  %v1359_v41 = vld [vmem:[%s4726_s2 + $0x20] sm:$0xff] }
 0x1e8   :  { %v446_v29 = vpop.permute.xlu2 %445  ;;  %2653 = vmatmul.msk.f32.gmra.mxu1 %vm1304_vm1, %v1273_v37  ;;  %2787 = vset.pattern.permute.xlu2 %v3122_v35  ;;  %v2790_v54 = vpack.i.bf16 %v1006_v39, %v1004_v62  ;;  %v2795_v44 = vpack.i.bf16 %v1095_v21, %v1093_v6  ;;  %v1183_v51 = vrot.slane %v3387_v27, 3  ;;  %v1180_v37 = vrot.slane %v3368_v36, 3  ;;  %v1365_v39 = vld [vmem:[%s4726_s2 + $0x50] sm:$0xff]  ;;  %v1362_v9 = vld [vmem:[%s4726_s2 + $0x38] sm:$0xff] }
 0x1e9   :  { %v546_v45 = vmul.f32 %v3259_v50, %v446_v29  ;;  %2786 = vset.pattern.permute.xlu1 %v3097_v28  ;;  %v569_v14 = vadd.f32 %v545_v34, %v376_v4  ;;  %v1181_v62 = vrot.slane %v3364_v26, 3  ;;  %1415 = vmatpush.msra.mxu0 %v1366_v52  ;;  %v1364_v29 = vld [vmem:[%s4726_s2 + $0x48] sm:$0xff]  ;;  %v1361_v34 = vld [vmem:[%s4726_s2 + $0x30] sm:$0xff]  ;;  %v1358_v47 = vld [vmem:[%s4726_s2 + $0x18] sm:$0xff] }
 0x1ea   :  { %2791 = vrot.lane.b32.xlu0 %v2790_v54, %s2925_s30  ;;  %v1363_v54 = vld [vmem:[%s4726_s2 + $0x40] sm:$0xff] }
 0x1eb   :  { %v570_v48 = vadd.f32 %v546_v45, %v377_v30  ;;  %v1184_v27 = vsel %vm1174_vm2, %v1181_v62, %v1183_v51  ;;  %1416 = vmatpush.msra.mxu0 %v1365_v39  ;;  %v1182_v45 = vsel %vm1174_vm2, %v1180_v37, %v1181_v62  ;;  %v355_v37 = vmul.f32 %v3213_v3, %v3198_v63 }
 0x1ec   :  { %v186_v62 = vmul.f32 %v3210_v1, %v3082_v24 }
 0x1ed   :  { %v763_v2 = vadd.f32 %v739_v19, %v570_v48  ;;  %1417 = vmatpush.msra.mxu0 %v1364_v29  ;;  %v2801_v48 = vpack.i.bf16 %v1184_v27, %v1182_v45  ;;  %v354_v27 = vmul.f32 %v3213_v3, %v3193_v61 }
 0x1ee   :  { %v633_v11 = vpop.permute.xlu1 %632 }
 0x1ef   :  { %v738_v15 = vmul.f32 %v3268_v42, %v633_v11  ;;  %1418 = vmatpush.msra.mxu0 %v1363_v54 }
 0x1f0   :  { %475 = vperm.xlu2 %2787, %v2979_v7  }
 0x1f1   :  { %469 = vperm.xlu1 %2786, %v2979_v7   ;;  %v762_v8 = vadd.f32 %v738_v15, %v569_v14  ;;  %1419 = vmatpush.msra.mxu0 %v1362_v9  ;;  %v1360_v15 = vld [vmem:[%s4726_s2 + $0x28] sm:$0xff] }
 0x1f2   :  { %487 = vperm.xlu0 %2766, %v3005_v12  }
 0x1f3   :  { %1420 = vmatpush.msra.mxu0 %v1361_v34 }
 0x1f5   :  { %1421 = vmatpush.msra.mxu0 %v1360_v15 }
 0x1f7   :  { %1422 = vmatpush.msra.mxu0 %v1359_v41 }
 0x1f8   :  { %2789 = vset.pattern.permute.xlu2 %v3077_v23  ;;  %v452_v6 = vpop.permute.xlu2 %451 }
 0x1f9   :  { %2788 = vset.pattern.permute.xlu1 %v3053_v18  ;;  %1423 = vmatpush.msra.mxu0 %v1358_v47  ;;  %v547_v63 = vmul.f32 %v3259_v50, %v452_v6 }
 0x1fa   :  { %2809 = vset.pattern.permute.xlu0 %v3190_v60 }
 0x1fb   :  { %1424 = vmatpush.msra.mxu0 %v1357_v38 }
 0x1fd   :  { %1425 = vmatpush.msra.mxu0 %v1356_v56 }
 0x1fe   :  { %v826_v57 = vpop.permute.xlu1 %825 }
 0x1ff   :  { %v931_v22 = vmul.f32 %v3306_v25, %v826_v57  ;;  %1426 = vmatpush.msra.mxu0 %v1355_v0 }
 0x200   :  { %668 = vperm.xlu2 %2789, %v2979_v7  }
 0x201   :  { %v3427_v31 = vadd.f32 %v931_v22, %v762_v8  ;;  %662 = vperm.xlu1 %2788, %v2979_v7  }
 0x202   :  { %849 = vperm.xlu0 %2809, %v2994_v10  }
 0x203   :  { %v1275_v49 = vrot.slane %v3427_v31, 4  ;;  %v1097_v58 = vrot.slane %v3427_v31, 2  ;;  %v1186_v13 = vrot.slane %v3427_v31, 3 }
 0x205   :  { %v1276_v10 = vsel %vm1263_vm0, %v1274_v46, %v1275_v49  ;;  %v1098_v57 = vsel %vm1085_vm3, %v1096_v40, %v1097_v58  ;;  %v1185_v46 = vrot.slane %v3422_v59, 3 }
 0x206   :  { %2654 = vmatmul.msk.f32.gmra.mxu1 %vm1304_vm1, %v1276_v10 }
 0x207   :  { %v1187_v21 = vsel %vm1174_vm2, %v1185_v46, %v1186_v13 }
 0x208   :  { %2800 = vset.pattern.permute.xlu2 %v3044_v17 }
 0x209   :  { %2796 = vrot.lane.b32.xlu1 %v2795_v44, %s2924_s29  ;;  %v645_v44 = vpop.permute.xlu2 %644 }
 0x20a   :  { %2807 = vset.pattern.permute.xlu1 %v3064_v20  ;;  %v740_v61 = vmul.f32 %v3268_v42, %v645_v44 }
 0x20e   :  { %v832_v30 = vpop.permute.xlu1 %831 }
 0x20f   :  { %v932_v19 = vmul.f32 %v3306_v25, %v832_v30  ;;  %v379_v30 = vadd.f32 %v355_v37, %v186_v62  ;;  %v4771_v62 = vld [vmem:[#allocation5_spill] sm:$0xff] }
 0x210   :  { %855 = vperm.xlu2 %2800, %v2979_v7  }
 0x211   :  { %v3473_v11 = vadd.f32 %v932_v19, %v763_v2  ;;  %2802 = vrot.lane.b32.xlu1 %v2801_v48, %s2923_s28 }
 0x213   :  { %v1277_v4 = vrot.slane %v3473_v11, 4  ;;  %v1099_v2 = vrot.slane %v3473_v11, 2  ;;  %v1188_v5 = vrot.slane %v3473_v11, 3 }
 0x215   :  { %v1278_v14 = vsel %vm1263_vm0, %v1275_v49, %v1277_v4  ;;  %v1100_v8 = vsel %vm1085_vm3, %v1097_v58, %v1099_v2  ;;  %v1189_v49 = vsel %vm1174_vm2, %v1186_v13, %v1188_v5  ;;  %v741_v2 = vmul.f32 %v3268_v42, %v3287_v32 }
 0x216   :  { %2655 = vmatmul.msk.f32.gmra.mxu1 %vm1304_vm1, %v1278_v14  ;;  %v2818_v22 = vpack.i.bf16 %v1100_v8, %v1098_v57  ;;  %v2825_v10 = vpack.i.bf16 %v1189_v49, %v1187_v21  ;;  %v1010_v14 = vrot.slane %v3473_v11, 1  ;;  %v1008_v8 = vrot.slane %v3427_v31, 1 }
 0x217   :  { %v1007_v5 = vrot.slane %v3422_v59, 1 }
 0x218   :  { %2819 = vrot.lane.b32.xlu0 %v2818_v22, %s2924_s29  ;;  %2806 = vset.pattern.permute.xlu2 %v3035_v16  ;;  %v1011_v11 = vsel %vm996_vm4, %v1008_v8, %v1010_v14 }
 0x219   :  { %674 = vperm.xlu1 %2807, %v2979_v7   ;;  %v1009_v38 = vsel %vm996_vm4, %v1007_v5, %v1008_v8 }
 0x21e   :  { %v458_v51 = vpop.permute.xlu1 %457 }
 0x21f   :  { %v548_v39 = vmul.f32 %v3259_v50, %v458_v51 }
 0x220   :  { %2826 = vrot.lane.b32.xlu0 %v2825_v10, %s2923_s28  ;;  %481 = vperm.xlu2 %2806, %v2979_v7   ;;  %v2813_v10 = vpack.i.bf16 %v1011_v11, %v1009_v38 }
 0x221   :  { %2810 = vset.pattern.permute.xlu1 %v3122_v35  ;;  %v572_v58 = vadd.f32 %v548_v39, %v379_v30  ;;  %v4772_v39 = vld [vmem:[#allocation18_spill] sm:$0xff]  ;;  %v4773_v30 = vld [vmem:[#allocation12_spill] sm:$0xff] }
 0x222   :  { %v2774_v52 = vpop.permute.xlu2 %2773 }
 0x223   :  { %v2775_v19 = vunpack.i.l.bf16 %v2774_v52  ;;  %v2776_v13 = vunpack.i.h.bf16 %v2774_v52 }
 0x228   :  { %885 = vperm.xlu0 %2809, %v3005_v12   ;;  %2808 = vset.pattern.permute.xlu2 %v3190_v60 }
 0x229   :  { %493 = vperm.xlu1 %2810, %v3005_v12  }
 0x22a   :  { %v844_v48 = vpop.permute.xlu2 %843 }
 0x230   :  { %2832 = vset.pattern.permute.xlu0 %v3173_v53  ;;  %867 = vperm.xlu2 %2808, %v2979_v7  }
 0x231   :  { %2812 = vset.pattern.permute.xlu1 %v3077_v23 }
 0x238   :  { %861 = vperm.xlu0 %2832, %v2979_v7   ;;  %2811 = vset.pattern.permute.xlu2 %v3053_v18  ;;  %v185_v7 = vmul.f32 %v3210_v1, %v3115_v33  ;;  %v934_v33 = vmul.f32 %v3306_v25, %v844_v48 }
 0x239   :  { %686 = vperm.xlu1 %2812, %v3005_v12  }
 0x23a   :  { %v2781_v29 = vpop.permute.xlu0 %2780  ;;  %v378_v34 = vadd.f32 %v354_v27, %v185_v7  ;;  %v657_v37 = vpop.permute.xlu2 %656  ;;  %v356_v27 = vmul.f32 %v3213_v3, %v4772_v39 }
 0x23b   :  { %v2769_v54 = vpop.permute.xlu1 %2768  ;;  %v2782_v24 = vunpack.i.l.bf16 %v2781_v29  ;;  %v2783_v21 = vunpack.i.h.bf16 %v2781_v29  ;;  %v742_v48 = vmul.f32 %v3268_v42, %v657_v37 }
 0x23c   :  { %v2770_v45 = vunpack.i.l.bf16 %v2769_v54  ;;  %v2771_v4 = vunpack.i.h.bf16 %v2769_v54  ;;  %v571_v57 = vadd.f32 %v547_v63, %v378_v34 }
 0x23e   :  { %v1305_v9 = vsel %vm1304_vm1, %v3313_v43, %v2770_v45  ;;  %v765_v43 = vadd.f32 %v741_v2, %v572_v58  ;;  %v764_v22 = vadd.f32 %v740_v61, %v571_v57  ;;  %v1306_v32 = vsel %vm1304_vm1, %v3316_v55, %v2771_v4 }
 0x23f   :  { %v1322_v40 = vsel %vm1321_vm5, %v1305_v9, %v2775_v19  ;;  %v1323_v56 = vsel %vm1321_vm5, %v1306_v32, %v2776_v13 }
 0x240   :  { %680 = vperm.xlu2 %2811, %v3005_v12   ;;  %v1339_v15 = vsel %vm1338_vm6, %v1322_v40, %v2782_v24  ;;  %v3553_v47 = vadd.f32 %v934_v33, %v765_v43  ;;  %v1340_v6 = vsel %vm1338_vm6, %v1323_v56, %v2783_v21 }
 0x241   :  { %2823 = vset.pattern.permute.xlu1 %v3044_v17  ;;  %1427 = vmatmul.f32.vlgmr.msra.gmra.mxu0 %v1339_v15 }
 0x242   :  { %v1280_v55 = vrot.slane %v3553_v47, 4  ;;  %v1013_v33 = vrot.slane %v3553_v47, 1  ;;  %v1102_v43 = vrot.slane %v3553_v47, 2 }
 0x243   :  { %v838_v41 = vpop.permute.xlu1 %837 }
 0x244   :  { %v933_v46 = vmul.f32 %v3306_v25, %v838_v41 }
 0x246   :  { %v3557_v49 = vadd.f32 %v933_v46, %v764_v22 }
 0x248   :  { %2824 = vset.pattern.permute.xlu2 %v3173_v53  ;;  %v1279_v0 = vrot.slane %v3557_v49, 4  ;;  %v1012_v4 = vrot.slane %v3557_v49, 1  ;;  %v1101_v57 = vrot.slane %v3557_v49, 2 }
 0x249   :  { %2814 = vrot.lane.b32.xlu2 %v2813_v10, %s2925_s30  ;;  %873 = vperm.xlu1 %2823, %v3005_v12  }
 0x24a   :  { %1430 = vmatmul.f32.gmra.mxu0 %v1340_v6  ;;  %v1281_v44 = vsel %vm1263_vm0, %v1279_v0, %v1280_v55  ;;  %v3588_v63 = vpop.permute.xlu2 %475  ;;  %v1014_v41 = vsel %vm996_vm4, %v1012_v4, %v1013_v33  ;;  %v1103_v46 = vsel %vm1085_vm3, %v1101_v57, %v1102_v43  ;;  %v1190_v0 = vrot.slane %v3557_v49, 3 }
 0x24b   :  { %2656 = vmatmul.msk.f32.gmra.mxu1 %vm1304_vm1, %v1281_v44 }
 0x251   :  { %879 = vperm.xlu2 %2824, %v3005_v12   ;;  %2830 = vset.pattern.permute.xlu1 %v3035_v16 }
 0x253   :  { %v464_v52 = vpop.permute.xlu1 %463 }
 0x254   :  { %v549_v45 = vmul.f32 %v3259_v50, %v464_v52 }
 0x259   :  { %2831 = vset.pattern.permute.xlu2 %v3064_v20  ;;  %499 = vperm.xlu1 %2830, %v3005_v12  }
 0x25a   :  { %v3597_v40 = vpop.permute.xlu2 %668 }
 0x25c   :  { %v3575_v51 = vpop.permute.xlu0 %2791 }
 0x25d   :  { %v2793_v38 = vunpack.i.l.bf16 %v3575_v51 }
 0x25f   :  { %v1307_v52 = vsel %vm1304_vm1, %v3368_v36, %v2793_v38 }
 0x261   :  { %692 = vperm.xlu2 %2831, %v3005_v12   ;;  %2833 = vset.pattern.permute.xlu1 %v3097_v28  ;;  %v187_v12 = vmul.f32 %v3210_v1, %v4773_v30 }
 0x263   :  { %v3581_v29 = vpop.permute.xlu1 %469  ;;  %v380_v7 = vadd.f32 %v356_v27, %v187_v12 }
 0x264   :  { %v3583_v54 = vpop.permute.xlu0 %487 }
 0x265   :  { %v573_v19 = vadd.f32 %v549_v45, %v380_v7  ;;  %v2794_v45 = vunpack.i.h.bf16 %v3575_v51 }
 0x267   :  { %v766_v9 = vadd.f32 %v742_v48, %v573_v19  ;;  %v1308_v48 = vsel %vm1304_vm1, %v3364_v26, %v2794_v45 }
 0x269   :  { %2834 = vset.pattern.permute.xlu2 %v3122_v35  ;;  %505 = vperm.xlu1 %2833, %v4771_v62  }
 0x26a   :  { %v856_v56 = vpop.permute.xlu2 %855 }
 0x271   :  { %511 = vperm.xlu2 %2834, %v4771_v62   ;;  %2835 = vset.pattern.permute.xlu1 %v3053_v18 }
 0x273   :  { %v3593_v58 = vpop.permute.xlu1 %662 }
 0x274   :  { %v850_v24 = vpop.permute.xlu0 %849  ;;  %v743_v38 = vmul.f32 %v3268_v42, %v3593_v58 }
 0x275   :  { %v935_v34 = vmul.f32 %v3306_v25, %v850_v24 }
 0x277   :  { %v959_v61 = vadd.f32 %v935_v34, %v766_v9 }
 0x279   :  { %2836 = vset.pattern.permute.xlu2 %v3077_v23  ;;  %698 = vperm.xlu1 %2835, %v4771_v62   ;;  %v1282_v2 = vrot.slane %v959_v61, 4  ;;  %v1015_v15 = vrot.slane %v959_v61, 1  ;;  %v1104_v14 = vrot.slane %v959_v61, 2  ;;  %v1193_v21 = vrot.slane %v959_v61, 3  ;;  %v4774_v61 = vld [vmem:[#allocation6_spill] sm:$0xff] }
 0x27a   :  { %v482_v36 = vpop.permute.xlu2 %481 }
 0x27b   :  { %v2797_v8 = vpop.permute.xlu1 %2796  ;;  %v1283_v22 = vsel %vm1263_vm0, %v1280_v55, %v1282_v2  ;;  %v1016_v5 = vsel %vm996_vm4, %v1013_v33, %v1015_v15  ;;  %v1105_v13 = vsel %vm1085_vm3, %v1102_v43, %v1104_v14  ;;  %v1191_v55 = vrot.slane %v3553_v47, 3  ;;  %v4775_v2 = vld [vmem:[#allocation25_spill] sm:$0xff]  ;;  %v4776_v33 = vld [vmem:[#allocation24_spill] sm:$0xff]  ;;  %v4777_v14 = vld [vmem:[#allocation7_spill] sm:$0xff] }
 0x27c   :  { %2657 = vmatmul.msk.f32.gmra.mxu1 %vm1304_vm1, %v1283_v22  ;;  %v2837_v32 = vpack.i.bf16 %v1016_v5, %v1014_v41  ;;  %v2842_v11 = vpack.i.bf16 %v1105_v13, %v1103_v46  ;;  %v2798_v10 = vunpack.i.l.bf16 %v2797_v8  ;;  %v2799_v7 = vunpack.i.h.bf16 %v2797_v8  ;;  %v4778_v43 = vld [vmem:[#allocation20_spill] sm:$0xff]  ;;  %v4779_v41 = vld [vmem:[#allocation13_spill] sm:$0xff]  ;;  %v4780_v13 = vld [vmem:[#allocation15_spill] sm:$0xff] }
 0x27d   :  { %v1194_v37 = vsel %vm1174_vm2, %v1191_v55, %v1193_v21  ;;  %v1192_v30 = vsel %vm1174_vm2, %v1190_v0, %v1191_v55  ;;  %v359_v15 = vmul.f32 %v3213_v3, %v4776_v33  ;;  %v188_v57 = vmul.f32 %v3210_v1, %v4777_v14 }
 0x27e   :  { %2838 = vrot.lane.b32.xlu0 %v2837_v32, %s2925_s30  ;;  %v1324_v39 = vsel %vm1321_vm5, %v1307_v52, %v2798_v10  ;;  %v2848_v12 = vpack.i.bf16 %v1194_v37, %v1192_v30  ;;  %v1325_v24 = vsel %vm1321_vm5, %v1308_v48, %v2799_v7  ;;  %v358_v8 = vmul.f32 %v3213_v3, %v4778_v43 }
 0x27f   :  { %v550_v22 = vmul.f32 %v3259_v50, %v3581_v29  ;;  %v190_v5 = vmul.f32 %v3210_v1, %v4779_v41  ;;  %v552_v32 = vmul.f32 %v3259_v50, %v482_v36  ;;  %v189_v46 = vmul.f32 %v3210_v1, %v4780_v13  ;;  %v4782_v13 = vld [vmem:[#allocation14_spill] sm:$0xff] }
 0x280   :  { %v551_v52 = vmul.f32 %v3259_v50, %v3588_v63  ;;  %v936_v37 = vmul.f32 %v3306_v25, %v856_v56  ;;  %v744_v7 = vmul.f32 %v3268_v42, %v3597_v40 }
 0x281   :  { %704 = vperm.xlu2 %2836, %v4771_v62   ;;  %2843 = vrot.lane.b32.xlu1 %v2842_v11, %s2924_s29  ;;  %v383_v29 = vadd.f32 %v359_v15, %v190_v5  ;;  %v382_v55 = vadd.f32 %v358_v8, %v189_v46  ;;  %v192_v46 = vmul.f32 %v3210_v1, %v4782_v13 }
 0x282   :  { %2854 = vset.pattern.permute.xlu1 %v3064_v20 }
 0x283   :  { %v2803_v6 = vpop.permute.xlu1 %2802 }
 0x284   :  { %v2804_v44 = vunpack.i.l.bf16 %v2803_v6  ;;  %v2805_v19 = vunpack.i.h.bf16 %v2803_v6 }
 0x286   :  { %897 = vperm.xlu0 %2832, %v4771_v62   ;;  %v1341_v27 = vsel %vm1338_vm6, %v1324_v39, %v2804_v44  ;;  %v1342_v34 = vsel %vm1338_vm6, %v1325_v24, %v2805_v19  ;;  %v576_v39 = vadd.f32 %v552_v32, %v383_v29  ;;  %v575_v24 = vadd.f32 %v551_v52, %v382_v55 }
 0x287   :  { %1433 = vmatmul.f32.gmra.mxu0 %v1341_v27 }
 0x289   :  { %2847 = vset.pattern.permute.xlu2 %v3044_v17  ;;  %2849 = vrot.lane.b32.xlu1 %v2848_v12, %s2923_s28 }
 0x28a   :  { %v2820_v9 = vpop.permute.xlu0 %2819  ;;  %v868_v51 = vpop.permute.xlu2 %867 }
 0x28b   :  { %v2821_v27 = vunpack.i.l.bf16 %v2820_v9  ;;  %v938_v19 = vmul.f32 %v3306_v25, %v868_v51 }
 0x28e   :  { %2856 = vset.pattern.permute.xlu0 %v3097_v28  ;;  %v357_v28 = vmul.f32 %v3213_v3, %v4775_v2  ;;  %v768_v2 = vadd.f32 %v744_v7, %v575_v24 }
 0x28f   :  { %1436 = vmatmul.f32.gmra.mxu0 %v1342_v34 }
 0x290   :  { %v381_v11 = vadd.f32 %v357_v28, %v188_v57  ;;  %v2822_v28 = vunpack.i.h.bf16 %v2820_v9  ;;  %v4781_v9 = vld [vmem:[#allocation21_spill] sm:$0xff] }
 0x291   :  { %891 = vperm.xlu2 %2847, %v4771_v62   ;;  %710 = vperm.xlu1 %2854, %v4771_v62  }
 0x292   :  { %v2827_v4 = vpop.permute.xlu0 %2826  ;;  %v574_v6 = vadd.f32 %v550_v22, %v381_v11  ;;  %v361_v22 = vmul.f32 %v3213_v3, %v4781_v9 }
 0x293   :  { %v2828_v12 = vunpack.i.l.bf16 %v2827_v4 }
 0x294   :  { %v767_v30 = vadd.f32 %v743_v38, %v574_v6 }
 0x296   :  { %523 = vperm.xlu0 %2856, %v4774_v61   ;;  %v3674_v34 = vadd.f32 %v936_v37, %v767_v30  ;;  %v4784_v37 = vld [vmem:[#allocation8_spill] sm:$0xff] }
 0x298   :  { %v1106_v43 = vrot.slane %v3674_v34, 2 }
 0x299   :  { %2853 = vset.pattern.permute.xlu2 %v3035_v16  ;;  %2857 = vset.pattern.permute.xlu1 %v3122_v35  ;;  %v675_v35 = vpop.permute.xlu1 %674 }
 0x29a   :  { %v3637_v26 = vpop.permute.xlu2 %680  ;;  %v3659_v21 = vpop.permute.xlu0 %885  ;;  %v745_v10 = vmul.f32 %v3268_v42, %v675_v35 }
 0x29c   :  { %v769_v36 = vadd.f32 %v745_v10, %v576_v39  ;;  %v4783_v10 = vld [vmem:[#allocation27_spill] sm:$0xff]  ;;  %v191_v39 = vmul.f32 %v3210_v1, %v4784_v37 }
 0x29e   :  { %2879 = vset.pattern.permute.xlu0 %v3190_v60  ;;  %v3678_v51 = vadd.f32 %v938_v19, %v769_v36  ;;  %v746_v36 = vmul.f32 %v3268_v42, %v3637_v26 }
 0x2a0   :  { %v1198_v52 = vrot.slane %v3678_v51, 3 }
 0x2a1   :  { %517 = vperm.xlu2 %2853, %v4771_v62   ;;  %529 = vperm.xlu1 %2857, %v4774_v61   ;;  %v494_v56 = vpop.permute.xlu1 %493 }
 0x2a2   :  { %v554_v11 = vmul.f32 %v3259_v50, %v494_v56 }
 0x2a3   :  { %v2815_v0 = vpop.permute.xlu2 %2814 }
 0x2a4   :  { %v2816_v44 = vunpack.i.l.bf16 %v2815_v0  ;;  %v2817_v45 = vunpack.i.h.bf16 %v2815_v0  ;;  %v360_v0 = vmul.f32 %v3213_v3, %v4783_v10 }
 0x2a6   :  { %v1309_v58 = vsel %vm1304_vm1, %v3422_v59, %v2816_v44  ;;  %v1310_v40 = vsel %vm1304_vm1, %v3427_v31, %v2817_v45  ;;  %v1109_v31 = vrot.slane %v3678_v51, 2  ;;  %v1195_v44 = vrot.slane %v3674_v34, 3 }
 0x2a7   :  { %v1326_v48 = vsel %vm1321_vm5, %v1309_v58, %v2821_v27  ;;  %v1327_v14 = vsel %vm1321_vm5, %v1310_v40, %v2822_v28  ;;  %v553_v27 = vmul.f32 %v3259_v50, %v3583_v54  ;;  %v384_v7 = vadd.f32 %v360_v0, %v191_v39 }
 0x2a8   :  { %v1343_v63 = vsel %vm1338_vm6, %v1326_v48, %v2828_v12  ;;  %v1287_v12 = vrot.slane %v3678_v51, 4 }
 0x2a9   :  { %2855 = vset.pattern.permute.xlu2 %v3190_v60  ;;  %2859 = vset.pattern.permute.xlu1 %v3077_v23  ;;  %v2829_v60 = vunpack.i.h.bf16 %v2827_v4  ;;  %v1284_v23 = vrot.slane %v3674_v34, 4 }
 0x2aa   :  { %1439 = vmatmul.f32.gmra.mxu0 %v1343_v63  ;;  %v862_v59 = vpop.permute.xlu0 %861  ;;  %v577_v63 = vadd.f32 %v553_v27, %v384_v7 }
 0x2ab   :  { %v937_v33 = vmul.f32 %v3306_v25, %v862_v59  ;;  %v1344_v35 = vsel %vm1338_vm6, %v1327_v14, %v2829_v60  ;;  %v687_v41 = vpop.permute.xlu1 %686  ;;  %v880_v6 = vpop.permute.xlu2 %879 }
 0x2ac   :  { %v747_v55 = vmul.f32 %v3268_v42, %v687_v41  ;;  %v940_v48 = vmul.f32 %v3306_v25, %v880_v6  ;;  %v770_v59 = vadd.f32 %v746_v36, %v577_v63  ;;  %v1493_v14 = vpop.f32.mrf.mxu1  ;;  %v4785_v41 = vld [vmem:[#allocation29_spill] sm:$0xff] }
 0x2ad   :  { %v3681_v15 = vadd.f32 %v937_v33, %v768_v2 }
 0x2af   :  { %v1285_v57 = vrot.slane %v3681_v15, 4  ;;  %v1107_v8 = vrot.slane %v3681_v15, 2  ;;  %v1196_v29 = vrot.slane %v3681_v15, 3  ;;  %v1018_v60 = vrot.slane %v3681_v15, 1 }
 0x2b1   :  { %903 = vperm.xlu2 %2855, %v4771_v62   ;;  %722 = vperm.xlu1 %2859, %v4774_v61   ;;  %v1286_v4 = vsel %vm1263_vm0, %v1284_v23, %v1285_v57  ;;  %v1108_v5 = vsel %vm1085_vm3, %v1106_v43, %v1107_v8  ;;  %v1110_v32 = vsel %vm1085_vm3, %v1107_v8, %v1109_v31  ;;  %v1020_v43 = vrot.slane %v3678_v51, 1  ;;  %v4786_v51 = vld [vmem:[#allocation9_spill] sm:$0xff] }
 0x2b2   :  { %1442 = vmatmul.f32.gmra.mxu0 %v1344_v35  ;;  %2658 = vmatmul.msk.f32.gmra.mxu1 %vm1304_vm1, %v1286_v4  ;;  %v2865_v38 = vpack.i.bf16 %v1110_v32, %v1108_v5  ;;  %v385_v62 = vadd.f32 %v361_v22, %v192_v46  ;;  %v1197_v45 = vsel %vm1174_vm2, %v1195_v44, %v1196_v29  ;;  %v1017_v8 = vrot.slane %v3674_v34, 1 }
 0x2b3   :  { %v1199_v58 = vsel %vm1174_vm2, %v1196_v29, %v1198_v52  ;;  %v1288_v54 = vsel %vm1263_vm0, %v1285_v57, %v1287_v12  ;;  %v1021_v9 = vsel %vm996_vm4, %v1018_v60, %v1020_v43  ;;  %v362_v4 = vmul.f32 %v3213_v3, %v4785_v41 }
 0x2b4   :  { %2866 = vrot.lane.b32.xlu0 %v2865_v38, %s2924_s29  ;;  %v578_v30 = vadd.f32 %v554_v11, %v385_v62  ;;  %v2872_v24 = vpack.i.bf16 %v1199_v58, %v1197_v45  ;;  %v1019_v31 = vsel %vm996_vm4, %v1017_v8, %v1018_v60  ;;  %v1496_v13 = vpop.f32.mrf.mxu1  ;;  %v193_v46 = vmul.f32 %v3210_v1, %v4786_v51 }
 0x2b5   :  { %v2860_v32 = vpack.i.bf16 %v1021_v9, %v1019_v31  ;;  %v941_v52 = vmul.f32 %v3306_v25, %v3659_v21  ;;  %v4788_v31 = vld [vmem:[#allocation19_spill] sm:$0xff] }
 0x2b6   :  { %v771_v19 = vadd.f32 %v747_v55, %v578_v30  ;;  %v386_v62 = vadd.f32 %v362_v4, %v193_v46  ;;  %v4789_v4 = vld [vmem:[#allocation28_spill] sm:$0xff] }
 0x2b7   :  { %v4790_v46 = vld [vmem:[#allocation16_spill] sm:$0xff] }
 0x2b8   :  { %v3722_v40 = vadd.f32 %v940_v48, %v771_v19 }
 0x2b9   :  { %2858 = vset.pattern.permute.xlu2 %v3053_v18  ;;  %2870 = vset.pattern.permute.xlu1 %v3044_v17  ;;  %v3731_v17 = vld [vmem:[%s4727_s3] ss:$0 sm:$0xff] }
 0x2ba   :  { %2659 = vmatmul.msk.f32.gmra.mxu1 %vm1304_vm1, %v1288_v54  ;;  %v1290_v33 = vrot.slane %v3722_v40, 4  ;;  %v1023_v58 = vrot.slane %v3722_v40, 1  ;;  %v1201_v63 = vrot.slane %v3722_v40, 3 }
 0x2bb   :  { %v874_v56 = vpop.permute.xlu1 %873  ;;  %v693_v55 = vpop.permute.xlu2 %692 }
 0x2bc   :  { %v939_v2 = vmul.f32 %v3306_v25, %v874_v56  ;;  %2873 = vrot.lane.b32.xlu0 %v2872_v24, %s2923_s28 }
 0x2be   :  { %v3726_v26 = vadd.f32 %v939_v2, %v770_v59  ;;  %v1428_v18 = vpop.f32.mrf.mxu0 }
 0x2bf   :  { %v1429_v23 = vadd.f32 %v3731_v17, %v1428_v18 }
 0x2c0   :  { %v1289_v28 = vrot.slane %v3726_v26, 4  ;;  %v1022_v12 = vrot.slane %v3726_v26, 1  ;;  %v1200_v54 = vrot.slane %v3726_v26, 3  ;;  %v1111_v18 = vrot.slane %v3726_v26, 2 }
 0x2c1   :  { %716 = vperm.xlu2 %2858, %v4774_v61   ;;  %909 = vperm.xlu1 %2870, %v4774_v61   ;;  %v1494_v22 = vadd.f32 %v1493_v14, %v1429_v23 }
 0x2c2   :  { %v1291_v57 = vsel %vm1263_vm0, %v1289_v28, %v1290_v33  ;;  %v1024_v21 = vsel %vm996_vm4, %v1022_v12, %v1023_v58  ;;  %v1202_v24 = vsel %vm1174_vm2, %v1200_v54, %v1201_v63  ;;  %v1112_v28 = vrot.slane %v3722_v40, 2 }
 0x2c3   :  { %2660 = vmatmul.msk.f32.gmra.mxu1 %vm1304_vm1, %v1291_v57  ;;  %v1541_v11 = vmax.f32 %v1494_v22, 0.0  ;;  %v4787_v57 = vld [vmem:[#allocation22_spill] sm:$0xff] }
 0x2c4   :  { %921 = vperm.xlu0 %2879, %v4774_v61   ;;  %v363_v43 = vmul.f32 %v3213_v3, %v4787_v57  ;;  %v4791_v57 = vld [vmem:[#allocation30_spill] sm:$0xff] }
 0x2c5   :  { %v1573_v6 = vrot.slane %v1541_v11, 1 }
 0x2c7   :  { %v1431_v35 = vpop.f32.mrf.mxu0 }
 0x2c8   :  { %v1432_v5 = vadd.f32 %v3731_v17, %v1431_v35 }
 0x2c9   :  { %2871 = vset.pattern.permute.xlu2 %v3173_v53  ;;  %2877 = vset.pattern.permute.xlu1 %v3035_v16  ;;  %v748_v53 = vmul.f32 %v3268_v42, %v693_v55 }
 0x2ca   :  { %v3753_v38 = vadd.f32 %v1496_v13, %v1432_v5  ;;  %2861 = vrot.lane.b32.xlu2 %v2860_v32, %s2925_s30  ;;  %v364_v5 = vmul.f32 %v3213_v3, %v4789_v4 }
 0x2cb   :  { %v500_v29 = vpop.permute.xlu1 %499  ;;  %v512_v56 = vpop.permute.xlu2 %511 }
 0x2cc   :  { %v1542_v10 = vmax.f32 %v3753_v38, 0.0  ;;  %v555_v0 = vmul.f32 %v3259_v50, %v500_v29  ;;  %v557_v29 = vmul.f32 %v3259_v50, %v512_v56 }
 0x2ce   :  { %v3761_v16 = vrot.slane %v1542_v10, 1  ;;  %v579_v44 = vadd.f32 %v555_v0, %v386_v62 }
 0x2d0   :  { %v1575_v37 = vsel %vm996_vm4, %v1573_v6, %v3761_v16  ;;  %v772_v39 = vadd.f32 %v748_v53, %v579_v44 }
 0x2d1   :  { %v3767_v27 = vmax.f32 %v1541_v11, %v1575_v37  ;;  %535 = vperm.xlu1 %2877, %v4774_v61   ;;  %v195_v11 = vmul.f32 %v3210_v1, %v4790_v46 }
 0x2d2   :  { %v965_v30 = vadd.f32 %v941_v52, %v772_v39  ;;  %915 = vperm.xlu2 %2871, %v4774_v61  }
 0x2d3   :  { %v388_v6 = vadd.f32 %v364_v5, %v195_v11 }
 0x2d4   :  { %v1292_v45 = vrot.slane %v965_v30, 4  ;;  %v1025_v7 = vrot.slane %v965_v30, 1  ;;  %v1114_v59 = vrot.slane %v965_v30, 2  ;;  %v1203_v8 = vrot.slane %v965_v30, 3 }
 0x2d5   :  { %v581_v52 = vadd.f32 %v557_v29, %v388_v6 }
 0x2d6   :  { %v1293_v36 = vsel %vm1263_vm0, %v1290_v33, %v1292_v45  ;;  %v1026_v19 = vsel %vm996_vm4, %v1023_v58, %v1025_v7  ;;  %v1115_v33 = vsel %vm1085_vm3, %v1112_v28, %v1114_v59  ;;  %v1204_v13 = vsel %vm1174_vm2, %v1201_v63, %v1203_v8 }
 0x2d7   :  { %2661 = vmatmul.msk.f32.gmra.mxu1 %vm1304_vm1, %v1293_v36  ;;  %v2880_v48 = vpack.i.bf16 %v1026_v19, %v1024_v21 }
 0x2d9   :  { %2881 = vrot.lane.b32.xlu1 %v2880_v48, %s2925_s30 }
 0x2da   :  { %2878 = vset.pattern.permute.xlu2 %v3064_v20  ;;  %v1113_v20 = vsel %vm1085_vm3, %v1111_v18, %v1112_v28 }
 0x2db   :  { %v506_v2 = vpop.permute.xlu1 %505  ;;  %v2885_v14 = vpack.i.bf16 %v1115_v33, %v1113_v20  ;;  %v705_v60 = vpop.permute.xlu2 %704 }
 0x2dc   :  { %v556_v9 = vmul.f32 %v3259_v50, %v506_v2  ;;  %v750_v53 = vmul.f32 %v3268_v42, %v705_v60 }
 0x2de   :  { %v774_v30 = vadd.f32 %v750_v53, %v581_v52 }
 0x2e1   :  { %1235 = vrot.lane.b32.xlu1 %v1202_v24, %s2923_s28 }
 0x2e2   :  { %728 = vperm.xlu2 %2878, %v4774_v61   ;;  %v194_v61 = vmul.f32 %v3210_v1, %v4788_v31 }
 0x2e4   :  { %v387_v22 = vadd.f32 %v363_v43, %v194_v61  ;;  %v365_v43 = vmul.f32 %v3213_v3, %v4791_v57  ;;  %v2012_v57 = vrot.slane %v3767_v27, 6 }
 0x2e6   :  { %v580_v51 = vadd.f32 %v556_v9, %v387_v22  ;;  %v4792_v9 = vld [vmem:[#allocation10_spill] sm:$0xff] }
 0x2e7   :  { %v196_v22 = vmul.f32 %v3210_v1, %v4792_v9 }
 0x2ea   :  { %2886 = vrot.lane.b32.xlu2 %v2885_v14, %s2924_s29 }
 0x2eb   :  { %v699_v23 = vpop.permute.xlu1 %698  ;;  %v892_v32 = vpop.permute.xlu2 %891 }
 0x2ec   :  { %v749_v35 = vmul.f32 %v3268_v42, %v699_v23  ;;  %v942_v55 = vmul.f32 %v3306_v25, %v892_v32 }
 0x2ee   :  { %v773_v0 = vadd.f32 %v749_v35, %v580_v51  ;;  %v1499_v35 = vpop.f32.mrf.mxu1 }
 0x2f0   :  { %v2839_v41 = vpop.permute.xlu0 %2838  ;;  %v3804_v37 = vadd.f32 %v942_v55, %v773_v0 }
 0x2f1   :  { %v2840_v44 = vunpack.i.l.bf16 %v2839_v41  ;;  %v2841_v2 = vunpack.i.h.bf16 %v2839_v41 }
 0x2f2   :  { %1237 = vrot.lane.b32.xlu2 %v1204_v13, %s2923_s28  ;;  %v1294_v19 = vrot.slane %v3804_v37, 4  ;;  %v1205_v48 = vrot.slane %v3804_v37, 3  ;;  %v1116_v54 = vrot.slane %v3804_v37, 2 }
 0x2f3   :  { %v2844_v62 = vpop.permute.xlu1 %2843  ;;  %v1311_v58 = vsel %vm1304_vm1, %v3557_v49, %v2840_v44  ;;  %v1312_v60 = vsel %vm1304_vm1, %v3553_v47, %v2841_v2  ;;  %v389_v47 = vadd.f32 %v365_v43, %v196_v22 }
 0x2f4   :  { %v2845_v12 = vunpack.i.l.bf16 %v2844_v62  ;;  %v2846_v20 = vunpack.i.h.bf16 %v2844_v62 }
 0x2f6   :  { %v1328_v63 = vsel %vm1321_vm5, %v1311_v58, %v2845_v12  ;;  %v1329_v61 = vsel %vm1321_vm5, %v1312_v60, %v2846_v20  ;;  %v1502_v55 = vpop.f32.mrf.mxu1  ;;  %v1027_v12 = vrot.slane %v3804_v37, 1  ;;  %v1614_v58 = vmax.f32 %v1542_v10, %v3761_v16 }
 0x2f8   :  { %v898_v39 = vpop.permute.xlu0 %897  ;;  %v2386_v16 = vrot.slane %v1614_v58, 4 }
 0x2f9   :  { %v943_v45 = vmul.f32 %v3306_v25, %v898_v39 }
 0x2fb   :  { %v3809_v7 = vadd.f32 %v943_v45, %v774_v30  ;;  %v2850_v36 = vpop.permute.xlu1 %2849  ;;  %v518_v23 = vpop.permute.xlu2 %517 }
 0x2fc   :  { %v2851_v21 = vunpack.i.l.bf16 %v2850_v36  ;;  %v2852_v14 = vunpack.i.h.bf16 %v2850_v36  ;;  %v558_v41 = vmul.f32 %v3259_v50, %v518_v23 }
 0x2fd   :  { %v1295_v24 = vrot.slane %v3809_v7, 4  ;;  %v1206_v56 = vrot.slane %v3809_v7, 3  ;;  %v1117_v59 = vrot.slane %v3809_v7, 2  ;;  %v1028_v53 = vrot.slane %v3809_v7, 1 }
 0x2fe   :  { %v1345_v49 = vsel %vm1338_vm6, %v1328_v63, %v2851_v21  ;;  %v1346_v4 = vsel %vm1338_vm6, %v1329_v61, %v2852_v14  ;;  %v582_v13 = vadd.f32 %v558_v41, %v389_v47 }
 0x2ff   :  { %1445 = vmatmul.f32.gmra.mxu0 %v1345_v49  ;;  %v1296_v18 = vsel %vm1263_vm0, %v1294_v19, %v1295_v24  ;;  %v1207_v28 = vsel %vm1174_vm2, %v1205_v48, %v1206_v56  ;;  %v1118_v33 = vsel %vm1085_vm3, %v1116_v54, %v1117_v59  ;;  %v1029_v48 = vsel %vm996_vm4, %v1027_v12, %v1028_v53 }
 0x300   :  { %2662 = vmatmul.msk.f32.gmra.mxu1 %vm1304_vm1, %v1296_v18  ;;  %1239 = vrot.lane.b32.xlu2 %v1207_v28, %s2923_s28  ;;  %v2264_v18 = vrot.slane %v1614_v58, 2 }
 0x301   :  { %1150 = vrot.lane.b32.xlu1 %v1118_v33, %s2924_s29 }
 0x303   :  { %v711_v31 = vpop.permute.xlu1 %710 }
 0x304   :  { %v1434_v8 = vpop.f32.mrf.mxu0  ;;  %v751_v32 = vmul.f32 %v3268_v42, %v711_v31 }
 0x305   :  { %v1435_v5 = vadd.f32 %v3731_v17, %v1434_v8 }
 0x306   :  { %v775_v11 = vadd.f32 %v751_v32, %v582_v13  ;;  %v4793_v13 = vld [vmem:[#allocation31_spill] sm:$0xff] }
 0x307   :  { %1448 = vmatmul.f32.gmra.mxu0 %v1346_v4  ;;  %v1500_v51 = vadd.f32 %v1499_v35, %v1435_v5 }
 0x308   :  { %v524_v41 = vpop.permute.xlu0 %523 }
 0x309   :  { %v1543_v44 = vmax.f32 %v1500_v51, 0.0  ;;  %v367_v51 = vmul.f32 %v3213_v3, %v4793_v13  ;;  %v559_v12 = vmul.f32 %v3259_v50, %v524_v41  ;;  %v1890_v41 = vrot.slane %v3767_v27, 4 }
 0x30b   :  { %v904_v46 = vpop.permute.xlu2 %903  ;;  %v1576_v63 = vrot.slane %v1543_v44, 1 }
 0x30c   :  { %v944_v29 = vmul.f32 %v3306_v25, %v904_v46  ;;  %v1437_v62 = vpop.f32.mrf.mxu0  ;;  %v1505_v46 = vpop.f32.mrf.mxu1 }
 0x30d   :  { %v1438_v0 = vadd.f32 %v3731_v17, %v1437_v62 }
 0x30e   :  { %v968_v6 = vadd.f32 %v944_v29, %v775_v11  ;;  %v4794_v29 = vld [vmem:[#allocation11_spill] sm:$0xff] }
 0x30f   :  { %v1503_v52 = vadd.f32 %v1502_v55, %v1438_v0  ;;  %v198_v62 = vmul.f32 %v3210_v1, %v4794_v29  ;;  %v4795_v0 = vld [vmem:[#allocation23_spill] sm:$0xff] }
 0x310   :  { %v1297_v39 = vrot.slane %v968_v6, 4  ;;  %v1208_v30 = vrot.slane %v968_v6, 3  ;;  %v1030_v45 = vrot.slane %v968_v6, 1  ;;  %v1119_v23 = vrot.slane %v968_v6, 2 }
 0x311   :  { %v1544_v36 = vmax.f32 %v1503_v52, 0.0  ;;  %v366_v55 = vmul.f32 %v3213_v3, %v4795_v0  ;;  %v4796_v52 = vld [vmem:[#allocation17_spill] sm:$0xff] }
 0x312   :  { %v1298_v21 = vsel %vm1263_vm0, %v1295_v24, %v1297_v39  ;;  %v1209_v19 = vsel %vm1174_vm2, %v1206_v56, %v1208_v30  ;;  %v1031_v54 = vsel %vm996_vm4, %v1028_v53, %v1030_v45  ;;  %v2508_v24 = vrot.slane %v1614_v58, 6 }
 0x313   :  { %v1577_v2 = vrot.slane %v1544_v36, 1  ;;  %2663 = vmatmul.msk.f32.gmra.mxu1 %vm1304_vm1, %v1298_v21  ;;  %1241 = vrot.lane.b32.xlu1 %v1209_v19, %s2923_s28  ;;  %v2890_v49 = vpack.i.bf16 %v1031_v54, %v1029_v48  ;;  %v1120_v35 = vsel %vm1085_vm3, %v1117_v59, %v1119_v23  ;;  %v530_v4 = vpop.permute.xlu1 %529  ;;  %v197_v39 = vmul.f32 %v3210_v1, %v4796_v52 }
 0x314   :  { %v560_v59 = vmul.f32 %v3259_v50, %v530_v4  ;;  %v391_v30 = vadd.f32 %v367_v51, %v198_v62 }
 0x315   :  { %v1578_v38 = vsel %vm996_vm4, %v1576_v63, %v1577_v2  ;;  %v1616_v10 = vmax.f32 %v1544_v36, %v1577_v2  ;;  %2891 = vrot.lane.b32.xlu0 %v2890_v49, %s2925_s30  ;;  %v390_v19 = vadd.f32 %v366_v55, %v197_v39 }
 0x316   :  { %v3853_v56 = vmax.f32 %v1543_v44, %v1578_v38  ;;  %v584_v48 = vadd.f32 %v560_v59, %v391_v30  ;;  %v1508_v38 = vpop.f32.mrf.mxu1 }
 0x317   :  { %v2142_v28 = vrot.slane %v1616_v10, 7  ;;  %v2265_v33 = vrot.slane %v1616_v10, 1  ;;  %v2387_v20 = vrot.slane %v1616_v10, 3  ;;  %v2509_v14 = vrot.slane %v1616_v10, 5 }
 0x318   :  { %v2013_v60 = vrot.slane %v3853_v56, 5  ;;  %v583_v10 = vadd.f32 %v559_v12, %v390_v19  ;;  %v1670_v51 = vrot.slane %v3853_v56, 1 }
 0x319   :  { %v3858_v43 = vsel %vm1671_vm7, %v2387_v20, %v2386_v16  ;;  %v3861_v8 = vsel %vm1671_vm7, %v2509_v14, %v2508_v24  ;;  %v3864_v31 = vsel %vm1671_vm7, %v2265_v33, %v2264_v18  ;;  %v3867_v61 = vsel %vm1671_vm7, %v2142_v28, %v1614_v58 }
 0x31a   :  { %v3870_v22 = vsel %vm1671_vm7, %v2013_v60, %v2012_v57 }
 0x31b   :  { %v717_v9 = vpop.permute.xlu2 %716 }
 0x31c   :  { %v752_v2 = vmul.f32 %v3268_v42, %v717_v9 }
 0x31d   :  { %1152 = vrot.lane.b32.xlu0 %v1120_v35, %s2924_s29  ;;  %v1669_v35 = vrot.slane %v3767_v27, 2 }
 0x31e   :  { %v776_v60 = vadd.f32 %v752_v2, %v583_v10 }
 0x323   :  { %v723_v53 = vpop.permute.xlu1 %722 }
 0x324   :  { %v2862_v5 = vpop.permute.xlu2 %2861  ;;  %v753_v58 = vmul.f32 %v3268_v42, %v723_v53 }
 0x325   :  { %v2863_v6 = vunpack.i.l.bf16 %v2862_v5  ;;  %v2864_v24 = vunpack.i.h.bf16 %v2862_v5 }
 0x326   :  { %v2867_v47 = vpop.permute.xlu0 %2866  ;;  %v777_v28 = vadd.f32 %v753_v58, %v584_v48  ;;  %v1672_v48 = vsel %vm1671_vm7, %v1670_v51, %v1669_v35 }
 0x327   :  { %v1440_v32 = vpop.f32.mrf.mxu0  ;;  %v2868_v44 = vunpack.i.l.bf16 %v2867_v47  ;;  %v1313_v63 = vsel %vm1304_vm1, %v3674_v34, %v2863_v6  ;;  %v2869_v14 = vunpack.i.h.bf16 %v2867_v47  ;;  %v1314_v47 = vsel %vm1304_vm1, %v3681_v15, %v2864_v24  ;;  %v4797_v24 = vld [vmem:[#allocation26_spill] sm:$0xff] }
 0x328   :  { %v1441_v11 = vadd.f32 %v3731_v17, %v1440_v32 }
 0x329   :  { %v1330_v18 = vsel %vm1321_vm5, %v1313_v63, %v2868_v44  ;;  %v1331_v29 = vsel %vm1321_vm5, %v1314_v47, %v2869_v14 }
 0x32a   :  { %v1506_v36 = vadd.f32 %v1505_v46, %v1441_v11  ;;  %v1794_v46 = vrot.slane %v3853_v56, 7  ;;  %v1891_v11 = vrot.slane %v3853_v56, 3 }
 0x32c   :  { %v916_v45 = vpop.permute.xlu2 %915  ;;  %v1545_v33 = vmax.f32 %v1506_v36, 0.0  ;;  %v1892_v63 = vsel %vm1671_vm7, %v1891_v11, %v1890_v41 }
 0x32d   :  { %v946_v49 = vmul.f32 %v3306_v25, %v916_v45 }
 0x32e   :  { %v2874_v21 = vpop.permute.xlu0 %2873  ;;  %v1579_v5 = vrot.slane %v1545_v33, 1 }
 0x32f   :  { %v1443_v54 = vpop.f32.mrf.mxu0  ;;  %v2875_v3 = vunpack.i.l.bf16 %v2874_v21  ;;  %v3897_v23 = vadd.f32 %v946_v49, %v777_v28  ;;  %v2876_v4 = vunpack.i.h.bf16 %v2874_v21 }
 0x330   :  { %v1444_v1 = vadd.f32 %v3731_v17, %v1443_v54 }
 0x331   :  { %v1347_v16 = vsel %vm1338_vm6, %v1330_v18, %v2875_v3  ;;  %v1300_v55 = vrot.slane %v3897_v23, 4  ;;  %v1348_v44 = vsel %vm1338_vm6, %v1331_v29, %v2876_v4  ;;  %v1211_v56 = vrot.slane %v3897_v23, 3 }
 0x332   :  { %v3895_v20 = vadd.f32 %v1508_v38, %v1444_v1  ;;  %1451 = vmatmul.f32.gmra.mxu0 %v1347_v16  ;;  %v1122_v52 = vrot.slane %v3897_v23, 2  ;;  %v1033_v39 = vrot.slane %v3897_v23, 1  ;;  %v1795_v3 = vsel %vm1671_vm7, %v1794_v46, %v3767_v27 }
 0x333   :  { %v910_v34 = vpop.permute.xlu1 %909 }
 0x334   :  { %v1546_v57 = vmax.f32 %v3895_v20, 0.0  ;;  %v945_v9 = vmul.f32 %v3306_v25, %v910_v34 }
 0x336   :  { %v3905_v32 = vrot.slane %v1546_v57, 1  ;;  %v3907_v13 = vadd.f32 %v945_v9, %v776_v60  ;;  %v922_v18 = vpop.permute.xlu0 %921 }
 0x338   :  { %v1581_v62 = vsel %vm996_vm4, %v1579_v5, %v3905_v32  ;;  %v1299_v0 = vrot.slane %v3907_v13, 4  ;;  %v1210_v59 = vrot.slane %v3907_v13, 3  ;;  %v1121_v15 = vrot.slane %v3907_v13, 2 }
 0x339   :  { %v1617_v6 = vmax.f32 %v1545_v33, %v1581_v62  ;;  %v1032_v53 = vrot.slane %v3907_v13, 1  ;;  %v947_v33 = vmul.f32 %v3306_v25, %v922_v18 }
 0x33a   :  { %1454 = vmatmul.f32.gmra.mxu0 %v1348_v44  ;;  %v1301_v58 = vsel %vm1263_vm0, %v1299_v0, %v1300_v55  ;;  %v1212_v36 = vsel %vm1174_vm2, %v1210_v59, %v1211_v56  ;;  %v1123_v21 = vsel %vm1085_vm3, %v1121_v15, %v1122_v52 }
 0x33b   :  { %v1796_v30 = vrot.slane %v1617_v6, 6  ;;  %v1893_v12 = vrot.slane %v1617_v6, 2  ;;  %v2015_v45 = vrot.slane %v1617_v6, 4  ;;  %2664 = vmatmul.msk.f32.gmra.mxu1 %vm1304_vm1, %v1301_v58  ;;  %v1034_v19 = vsel %vm996_vm4, %v1032_v53, %v1033_v39  ;;  %1243 = vrot.lane.b32.xlu1 %v1212_v36, %s2923_s28 }
 0x33c   :  { %1154 = vrot.lane.b32.xlu0 %v1123_v21, %s2924_s29  ;;  %v3935_v54 = vsel %vm1673_vm8, %v1617_v6, %v1672_v48  ;;  %1065 = vrot.lane.b32.xlu2 %v1034_v19, %s2925_s30  ;;  %v729_v38 = vpop.permute.xlu2 %728 }
 0x33d   :  { %v3942_v2 = vsel %vm1673_vm8, %v1796_v30, %v1795_v3  ;;  %v3945_v49 = vsel %vm1673_vm8, %v1893_v12, %v1892_v63  ;;  %v3949_v1 = vsel %vm1673_vm8, %v2015_v45, %v3870_v22  ;;  %v754_v16 = vmul.f32 %v3268_v42, %v729_v38 }
 0x343   :  { %v536_v10 = vpop.permute.xlu1 %535 }
 0x344   :  { %v561_v27 = vmul.f32 %v3259_v50, %v536_v10  ;;  %v2887_v5 = vpop.permute.xlu2 %2886 }
 0x345   :  { %v2888_v46 = vunpack.i.l.bf16 %v2887_v5  ;;  %v2889_v59 = vunpack.i.h.bf16 %v2887_v5 }
 0x346   :  { %v585_v28 = vadd.f32 %v561_v27, %v4797_v24 }
 0x348   :  { %v778_v14 = vadd.f32 %v754_v16, %v585_v28 }
 0x34a   :  { %v971_v34 = vadd.f32 %v947_v33, %v778_v14 }
 0x34b   :  { %v2882_v60 = vpop.permute.xlu1 %2881 }
 0x34c   :  { %v2883_v9 = vunpack.i.l.bf16 %v2882_v60  ;;  %v1302_v35 = vrot.slane %v971_v34, 4  ;;  %v1213_v41 = vrot.slane %v971_v34, 3  ;;  %v1124_v4 = vrot.slane %v971_v34, 2  ;;  %v1238_v15 = vpop.permute.xlu2 %1237 }
 0x34d   :  { %v1035_v22 = vrot.slane %v971_v34, 1  ;;  %v2884_v11 = vunpack.i.h.bf16 %v2882_v60 }
 0x34e   :  { %v1303_v47 = vsel %vm1263_vm0, %v1300_v55, %v1302_v35  ;;  %v1214_v51 = vsel %vm1174_vm2, %v1211_v56, %v1213_v41  ;;  %v1125_v50 = vsel %vm1085_vm3, %v1122_v52, %v1124_v4  ;;  %v1315_v42 = vsel %vm1304_vm1, %v3726_v26, %v2883_v9  ;;  %v1511_v56 = vpop.f32.mrf.mxu1 }
 0x34f   :  { %2665 = vmatmul.msk.f32.gmra.mxu1 %vm1304_vm1, %v1303_v47  ;;  %1245 = vrot.lane.b32.xlu1 %v1214_v51, %s2923_s28  ;;  %v1036_v25 = vsel %vm996_vm4, %v1033_v39, %v1035_v22  ;;  %v1332_v62 = vsel %vm1321_vm5, %v1315_v42, %v2888_v46  ;;  %v1316_v55 = vsel %vm1304_vm1, %v3722_v40, %v2884_v11  ;;  %vm2121_vm0 = vcmask 23552  }
 0x350   :  { %1156 = vrot.lane.b32.xlu0 %v1125_v50, %s2924_s29  ;;  %1067 = vrot.lane.b32.xlu2 %v1036_v25, %s2925_s30  ;;  %v1333_v6 = vsel %vm1321_vm5, %v1316_v55, %v2889_v59  ;;  %vm2373_vm2 = vcmask 39936   ;;  %vm2495_vm3 = vcmask 48128  }
 0x351   :  { %v1350_v53 = vsel %vm1338_vm6, %v1333_v6, %v1238_v15 }
 0x353   :  { %v1236_v29 = vpop.permute.xlu1 %1235 }
 0x354   :  { %v1349_v0 = vsel %vm1338_vm6, %v1332_v62, %v1236_v29 }
 0x355   :  { %1457 = vmatmul.f32.gmra.mxu0 %v1349_v0 }
 0x356   :  { %v1514_v12 = vpop.f32.mrf.mxu1 }
 0x35a   :  { %v1240_v3 = vpop.permute.xlu2 %1239 }
 0x35d   :  { %1460 = vmatmul.f32.gmra.mxu0 %v1350_v53 }
 0x35e   :  { %v1517_v25 = vpop.f32.mrf.mxu1 }
 0x366   :  { %v1520_v62 = vpop.f32.mrf.mxu1 }
 0x373   :  { %v1151_v19 = vpop.permute.xlu1 %1150 }
 0x37c   :  { %v1446_v44 = vpop.f32.mrf.mxu0 }
 0x37d   :  { %v1447_v26 = vadd.f32 %v3731_v17, %v1446_v44 }
 0x37f   :  { %v1512_v52 = vadd.f32 %v1511_v56, %v1447_v26 }
 0x381   :  { %v1547_v45 = vmax.f32 %v1512_v52, 0.0 }
 0x383   :  { %v1582_v63 = vrot.slane %v1547_v45, 1 }
 0x384   :  { %v1449_v39 = vpop.f32.mrf.mxu0 }
 0x385   :  { %v1450_v30 = vadd.f32 %v3731_v17, %v1449_v39  ;;  %v1242_v4 = vpop.permute.xlu1 %1241 }
 0x387   :  { %v3973_v58 = vadd.f32 %v1514_v12, %v1450_v30  ;;  %v2892_v40 = vpop.permute.xlu0 %2891 }
 0x388   :  { %v2893_v36 = vunpack.i.l.bf16 %v2892_v40  ;;  %v2894_v10 = vunpack.i.h.bf16 %v2892_v40 }
 0x389   :  { %v1548_v21 = vmax.f32 %v3973_v58, 0.0 }
 0x38a   :  { %v1317_v48 = vsel %vm1304_vm1, %v3804_v37, %v2893_v36  ;;  %v1318_v34 = vsel %vm1304_vm1, %v3809_v7, %v2894_v10  ;;  %v1523_v36 = vpop.f32.mrf.mxu1 }
 0x38b   :  { %v3980_v18 = vrot.slane %v1548_v21, 1  ;;  %v1334_v38 = vsel %vm1321_vm5, %v1317_v48, %v1151_v19 }
 0x38c   :  { %v1351_v16 = vsel %vm1338_vm6, %v1334_v38, %v1240_v3 }
 0x38d   :  { %v1584_v27 = vsel %vm996_vm4, %v1582_v63, %v3980_v18  ;;  %1463 = vmatmul.f32.gmra.mxu0 %v1351_v16 }
 0x38e   :  { %v1619_v24 = vmax.f32 %v1547_v45, %v1584_v27 }
 0x38f   :  { %v1153_v28 = vpop.permute.xlu0 %1152 }
 0x390   :  { %v1798_v33 = vrot.slane %v1619_v24, 5  ;;  %v1895_v37 = vrot.slane %v1619_v24, 1  ;;  %v2017_v14 = vrot.slane %v1619_v24, 3  ;;  %v1335_v60 = vsel %vm1321_vm5, %v1318_v34, %v1153_v28  ;;  %v4045_v34 = vld [vmem:[%s4728_s4 + $0xe0] sm:$0xff] }
 0x391   :  { %v1675_v9 = vrot.slane %v1619_v24, 7  ;;  %v1352_v7 = vsel %vm1338_vm6, %v1335_v60, %v1242_v4  ;;  %2166 = vmatpush.msrb.mxu1 %v4045_v34  ;;  %2288 = vmatpush.msrb.mxu0 %v4045_v34 }
 0x392   :  { %v3991_v35 = vsel %vm1676_vm9, %v1798_v33, %v3942_v2  ;;  %v3995_v41 = vsel %vm1676_vm9, %v1895_v37, %v3945_v49  ;;  %v2018_v5 = vsel %vm1676_vm9, %v2017_v14, %v3949_v1  ;;  %v1526_v63 = vpop.f32.mrf.mxu1  ;;  %1700 = vmatpush.msra.mxu2 %v4045_v34 }
 0x393   :  { %4798 = vst [vmem:[#allocation5_spill] sm:$0xff] %v3995_v41  ;;  %v3999_v22 = vsel %vm1676_vm9, %v1675_v9, %v3935_v54 }
 0x395   :  { %1466 = vmatmul.f32.gmra.mxu0 %v1352_v7 }
 0x396   :  { %v1066_v47 = vpop.permute.xlu2 %1065 }
 0x397   :  { %v1319_v2 = vsel %vm1304_vm1, %v3907_v13, %v1066_v47 }
 0x39a   :  { %v1529_v9 = vpop.f32.mrf.mxu1 }
 0x3aa   :  { %v1068_v59 = vpop.permute.xlu2 %1067 }
 0x3ab   :  { %v1320_v26 = vsel %vm1304_vm1, %v3897_v23, %v1068_v59  ;;  %v4106_v59 = vld [vmem:[%s4728_s4 + $0x60] sm:$0xff]  ;;  %vm2251_vm1 = vcmask 31744  }
 0x3ad   :  { %v1244_v50 = vpop.permute.xlu1 %1243 }
 0x3ae   :  { %v1155_v51 = vpop.permute.xlu0 %1154 }
 0x3af   :  { %v1336_v49 = vsel %vm1321_vm5, %v1319_v2, %v1155_v51  ;;  %v1452_v42 = vpop.f32.mrf.mxu0  ;;  %v1532_v2 = vpop.f32.mrf.mxu1  ;;  %v4055_v51 = vld [vmem:[%s4728_s4 + $0xe8] sm:$0xff] }
 0x3b0   :  { %v1353_v46 = vsel %vm1338_vm6, %v1336_v49, %v1244_v50  ;;  %v1453_v54 = vadd.f32 %v3731_v17, %v1452_v42  ;;  %1720 = vmatpush.msra.mxu3 %v4055_v51  ;;  %v4063_v49 = vld [vmem:[%s4728_s4 + $0xc0] sm:$0xff]  ;;  %v4070_v42 = vld [vmem:[%s4728_s4 + $0xc8] sm:$0xff] }
 0x3b1   :  { %1469 = vmatmul.f32.gmra.mxu0 %v1353_v46  ;;  %2167 = vmatpush.msrb.mxu1 %v4063_v49  ;;  %v4075_v46 = vld [vmem:[%s4728_s4 + $0xa0] sm:$0xff] }
 0x3b2   :  { %v1518_v11 = vadd.f32 %v1517_v25, %v1453_v54  ;;  %1701 = vmatpush.msra.mxu2 %v4063_v49  ;;  %v4080_v54 = vld [vmem:[%s4728_s4 + $0xa8] sm:$0xff]  ;;  %1721 = vmatpush.msra.mxu3 %v4070_v42 }
 0x3b3   :  { %2289 = vmatpush.msrb.mxu0 %v4063_v49  ;;  %2168 = vmatpush.msrb.mxu1 %v4075_v46 }
 0x3b4   :  { %v1549_v0 = vmax.f32 %v1518_v11, 0.0  ;;  %1702 = vmatpush.msra.mxu2 %v4075_v46  ;;  %1722 = vmatpush.msra.mxu3 %v4080_v54 }
 0x3b5   :  { %2290 = vmatpush.msrb.mxu0 %v4075_v46 }
 0x3b6   :  { %v1585_v6 = vrot.slane %v1549_v0, 1 }
 0x3b7   :  { %v1455_v1 = vpop.f32.mrf.mxu0 }
 0x3b8   :  { %v1456_v29 = vadd.f32 %v3731_v17, %v1455_v1  ;;  %v4088_v1 = vld [vmem:[%s4728_s4 + $0x80] sm:$0xff] }
 0x3b9   :  { %2169 = vmatpush.msrb.mxu1 %v4088_v1  ;;  %1703 = vmatpush.msra.mxu2 %v4088_v1 }
 0x3ba   :  { %v4010_v55 = vadd.f32 %v1520_v62, %v1456_v29  ;;  %v4095_v29 = vld [vmem:[%s4728_s4 + $0x88] sm:$0xff]  ;;  %2291 = vmatpush.msrb.mxu0 %v4088_v1 }
 0x3bb   :  { %1723 = vmatpush.msra.mxu3 %v4095_v29  ;;  %2170 = vmatpush.msrb.mxu1 %v4106_v59 }
 0x3bc   :  { %v1550_v13 = vmax.f32 %v4010_v55, 0.0  ;;  %1704 = vmatpush.msra.mxu2 %v4106_v59  ;;  %2292 = vmatpush.msrb.mxu0 %v4106_v59 }
 0x3be   :  { %v4015_v15 = vrot.slane %v1550_v13, 1 }
 0x3c0   :  { %v1587_v53 = vsel %vm996_vm4, %v1585_v6, %v4015_v15  ;;  %v4113_v6 = vld [vmem:[%s4728_s4 + $0x68] sm:$0xff] }
 0x3c1   :  { %v1246_v44 = vpop.permute.xlu1 %1245  ;;  %v4021_v56 = vmax.f32 %v1549_v0, %v1587_v53  ;;  %1724 = vmatpush.msra.mxu3 %v4113_v6 }
 0x3c2   :  { %v1157_v52 = vpop.permute.xlu0 %1156 }
 0x3c3   :  { %v1337_v39 = vsel %vm1321_vm5, %v1320_v26, %v1157_v52  ;;  %v2019_v12 = vrot.slane %v4021_v56, 2  ;;  %v4131_v52 = vld [vmem:[%s4728_s4 + $0x48] sm:$0xff] }
 0x3c4   :  { %v1354_v30 = vsel %vm1338_vm6, %v1337_v39, %v1246_v44  ;;  %v4122_v44 = vld [vmem:[%s4728_s4 + $0x40] sm:$0xff]  ;;  %1725 = vmatpush.msra.mxu3 %v4131_v52 }
 0x3c5   :  { %1472 = vmatmul.f32.gmra.mxu0 %v1354_v30  ;;  %v2020_v45 = vsel %vm1679_vm10, %v2019_v12, %v2018_v5  ;;  %v4138_v39 = vld [vmem:[%s4728_s4 + $0x20] sm:$0xff]  ;;  %2171 = vmatpush.msrb.mxu1 %v4122_v44  ;;  %v4145_v30 = vld [vmem:[%s4728_s4 + $0x28] sm:$0xff] }
 0x3c6   :  { %1705 = vmatpush.msra.mxu2 %v4122_v44  ;;  %2293 = vmatpush.msrb.mxu0 %v4122_v44 }
 0x3c7   :  { %2172 = vmatpush.msrb.mxu1 %v4138_v39  ;;  %1726 = vmatpush.msra.mxu3 %v4145_v30 }
 0x3c8   :  { %1706 = vmatpush.msra.mxu2 %v4138_v39  ;;  %2294 = vmatpush.msrb.mxu0 %v4138_v39 }
 0x3d2   :  { %v1458_v40 = vpop.f32.mrf.mxu0 }
 0x3d3   :  { %v1459_v19 = vadd.f32 %v3731_v17, %v1458_v40  ;;  %v4163_v40 = vld [vmem:[%s4728_s4 + $0x8] sm:$0xff] }
 0x3d4   :  { %1727 = vmatpush.msra.mxu3 %v4163_v40 }
 0x3d5   :  { %v1524_v48 = vadd.f32 %v1523_v36, %v1459_v19  ;;  %v4168_v36 = vld [vmem:[%s4728_s4 + $0xf8] sm:$0xff]  ;;  %v4179_v19 = vld [vmem:[%s4728_s4 + $0xf0] sm:$0xff] }
 0x3d6   :  { %1760 = vmatpush.msrb.mxu3 %v4168_v36 }
 0x3d7   :  { %v1551_v38 = vmax.f32 %v1524_v48, 0.0  ;;  %v4186_v48 = vld [vmem:[%s4728_s4 + $0xd8] sm:$0xff] }
 0x3d8   :  { %1761 = vmatpush.msrb.mxu3 %v4186_v48 }
 0x3d9   :  { %v1588_v27 = vrot.slane %v1551_v38, 1 }
 0x3da   :  { %v1461_v3 = vpop.f32.mrf.mxu0 }
 0x3db   :  { %v1462_v23 = vadd.f32 %v3731_v17, %v1461_v3  ;;  %v4193_v3 = vld [vmem:[%s4728_s4 + $0xd0] sm:$0xff] }
 0x3dd   :  { %v4029_v10 = vadd.f32 %v1526_v63, %v1462_v23  ;;  %v4200_v23 = vld [vmem:[%s4728_s4 + $0xb8] sm:$0xff]  ;;  %v4207_v63 = vld [vmem:[%s4728_s4 + $0xb0] sm:$0xff] }
 0x3de   :  { %1762 = vmatpush.msrb.mxu3 %v4200_v23 }
 0x3df   :  { %v4735_v16 = vmax.f32 %v4029_v10, 0.0  ;;  %v4803_v58 = vmax.f32 %v4029_v10, 0.0 }
 0x3e1   :  { %v4034_v24 = vrot.slane %v4735_v16, 1  ;;  %v4297_v16 = vmax.f32 %v1550_v13, %v4015_v15 }
 0x3e3   :  { %v1590_v28 = vsel %vm996_vm4, %v1588_v27, %v4034_v24  ;;  %v4221_v27 = vld [vmem:[%s4728_s4 + $0x90] sm:$0xff]  ;;  %v2148_v15 = vrot.slane %v4297_v16, 4 }
 0x3e4   :  { %v4038_v33 = vmax.f32 %v1551_v38, %v1590_v28  ;;  %v4214_v38 = vld [vmem:[%s4728_s4 + $0x98] sm:$0xff] }
 0x3e5   :  { %v4228_v28 = vld [vmem:[%s4728_s4 + $0x78] sm:$0xff]  ;;  %1763 = vmatpush.msrb.mxu3 %v4214_v38 }
 0x3e6   :  { %v2021_v37 = vrot.slane %v4038_v33, 1 }
 0x3e7   :  { %1764 = vmatpush.msrb.mxu3 %v4228_v28 }
 0x3e8   :  { %v2022_v14 = vsel %vm1682_vm11, %v2021_v37, %v2020_v45  ;;  %v4156_v45 = vld [vmem:[%s4728_s4] sm:$0xff]  ;;  %v4235_v37 = vld [vmem:[%s4728_s4 + $0x70] sm:$0xff] }
 0x3e9   :  { %2173 = vmatpush.msrb.mxu1 %v4156_v45  ;;  %1707 = vmatpush.msra.mxu2 %v4156_v45  ;;  %4799 = vst [vmem:[#allocation18_spill] sm:$0xff] %v4235_v37 }
 0x3ea   :  { %2295 = vmatpush.msrb.mxu0 %v4156_v45 }
 0x3eb   :  { %2226 = vmatpush.msra.mxu1 %v4168_v36  ;;  %1740 = vmatpush.msrb.mxu2 %v4179_v19 }
 0x3ec   :  { %2410 = vmatpush.msra.mxu0 %v4045_v34 }
 0x3ed   :  { %2227 = vmatpush.msra.mxu1 %v4186_v48  ;;  %1741 = vmatpush.msrb.mxu2 %v4193_v3 }
 0x3ee   :  { %2411 = vmatpush.msra.mxu0 %v4063_v49 }
 0x3ef   :  { %2228 = vmatpush.msra.mxu1 %v4200_v23  ;;  %1742 = vmatpush.msrb.mxu2 %v4207_v63 }
 0x3f0   :  { %2412 = vmatpush.msra.mxu0 %v4075_v46 }
 0x3f1   :  { %2229 = vmatpush.msra.mxu1 %v4214_v38  ;;  %1743 = vmatpush.msrb.mxu2 %v4221_v27 }
 0x3f2   :  { %2413 = vmatpush.msra.mxu0 %v4088_v1 }
 0x3f3   :  { %2230 = vmatpush.msra.mxu1 %v4228_v28  ;;  %1744 = vmatpush.msrb.mxu2 %v4235_v37 }
 0x3f4   :  { %2414 = vmatpush.msra.mxu0 %v4106_v59 }
 0x3f6   :  { %2415 = vmatpush.msra.mxu0 %v4122_v44 }
 0x3f8   :  { %2416 = vmatpush.msra.mxu0 %v4138_v39 }
 0x3fa   :  { %2417 = vmatpush.msra.mxu0 %v4156_v45 }
 0x40a   :  { %v1464_v60 = vpop.f32.mrf.mxu0 }
 0x40b   :  { %v1465_v4 = vadd.f32 %v3731_v17, %v1464_v60  ;;  %v4247_v60 = vld [vmem:[%s4728_s4 + $0x50] sm:$0xff] }
 0x40c   :  { %4800 = vst [vmem:[#allocation12_spill] sm:$0xff] %v4247_v60  ;;  %1745 = vmatpush.msrb.mxu2 %v4247_v60 }
 0x40d   :  { %v1530_v5 = vadd.f32 %v1529_v9, %v1465_v4  ;;  %v4254_v9 = vld [vmem:[%s4728_s4 + $0x38] sm:$0xff]  ;;  %v4259_v4 = vld [vmem:[%s4728_s4 + $0x30] sm:$0xff] }
 0x40e   :  { %4801 = vst [vmem:[#allocation6_spill] sm:$0xff] %v4259_v4  ;;  %1746 = vmatpush.msrb.mxu2 %v4259_v4 }
 0x40f   :  { %v1553_v50 = vmax.f32 %v1530_v5, 0.0  ;;  %v4268_v5 = vld [vmem:[%s4728_s4 + $0x18] sm:$0xff] }
 0x411   :  { %v1591_v62 = vrot.slane %v1553_v50, 1 }
 0x412   :  { %v1467_v7 = vpop.f32.mrf.mxu0 }
 0x413   :  { %v1468_v47 = vadd.f32 %v3731_v17, %v1467_v7  ;;  %v4273_v7 = vld [vmem:[%s4728_s4 + $0x10] sm:$0xff] }
 0x414   :  { %4802 = vst [vmem:[#allocation25_spill] sm:$0xff] %v4273_v7  ;;  %1747 = vmatpush.msrb.mxu2 %v4273_v7 }
 0x415   :  { %v4057_v25 = vadd.f32 %v1532_v2, %v1468_v47  ;;  %v1535_v2 = vpop.f32.mrf.mxu1 }
 0x417   :  { %v4734_v11 = vmax.f32 %v4057_v25, 0.0 }
 0x419   :  { %v4099_v0 = vrot.slane %v4734_v11, 1 }
 0x41b   :  { %v1593_v53 = vsel %vm996_vm4, %v1591_v62, %v4099_v0  ;;  %v4287_v62 = vmax.f32 %v1546_v57, %v3905_v32 }
 0x41c   :  { %v4124_v26 = vmax.f32 %v1553_v50, %v1593_v53  ;;  %v4292_v53 = vmax.f32 %v1548_v21, %v3980_v18  ;;  %v4307_v21 = vmax.f32 %v4803_v58, %v4034_v24  ;;  %v1681_v58 = vrot.slane %v4038_v33, 5 }
 0x41d   :  { %v2144_v7 = vrot.slane %v4287_v62, 6  ;;  %v1538_v32 = vpop.f32.mrf.mxu1  ;;  %v2267_v10 = vsel %vm1673_vm8, %v4287_v62, %v3864_v31 }
 0x41e   :  { %v4149_v12 = vsel %vm1685_vm12, %v4124_v26, %v2022_v14  ;;  %v4242_v14 = vld [vmem:[%s4728_s4 + $0x58] sm:$0xff]  ;;  %v2146_v57 = vrot.slane %v4292_v53, 5  ;;  %v2268_v13 = vrot.slane %v4292_v53, 7  ;;  %v1684_v4 = vrot.slane %v4124_v26, 4 }
 0x41f   :  { %2231 = vmatpush.msra.mxu1 %v4242_v14  ;;  %1765 = vmatpush.msrb.mxu3 %v4242_v14 }
 0x421   :  { %2232 = vmatpush.msra.mxu1 %v4254_v9  ;;  %1766 = vmatpush.msrb.mxu3 %v4254_v9 }
 0x423   :  { %2233 = vmatpush.msra.mxu1 %v4268_v5  ;;  %1767 = vmatpush.msrb.mxu3 %v4268_v5 }
 0x42e   :  { %v1470_v47 = vpop.f32.mrf.mxu0 }
 0x42f   :  { %v1471_v50 = vadd.f32 %v3731_v17, %v1470_v47  ;;  %v2896_v17 = vld [vmem:[%s4727_s3] ss:$0 sm:$0xff]  ;;  %v4804_v47 = vmax.f32 %v4057_v25, 0.0  ;;  %s2926_s3 = smov 5  }
 0x431   :  { %v1536_v11 = vadd.f32 %v1535_v2, %v1471_v50  ;;  %v4314_v2 = vmax.f32 %v4804_v47, %v4099_v0  ;;  %v2272_v0 = vrot.slane %v4307_v21, 5 }
 0x433   :  { %v1555_v18 = vmax.f32 %v1536_v11, 0.0  ;;  %v2150_v11 = vrot.slane %v4307_v21, 3  ;;  %v2274_v31 = vrot.slane %v4314_v2, 4 }
 0x442   :  { %v1473_v41 = vpop.f32.mrf.mxu0 }
 0x443   :  { %v1474_v20 = vadd.f32 %v2896_v17, %v1473_v41  ;;  %v2270_v41 = vrot.slane %v4297_v16, 6  ;;  %v2145_v17 = vsel %vm1673_vm8, %v2144_v7, %v3867_v61  ;;  %v2152_v61 = vrot.slane %v4314_v2, 2 }
 0x444   :  { %v2147_v24 = vsel %vm1676_vm9, %v2146_v57, %v2145_v17  ;;  %v2269_v7 = vsel %vm1676_vm9, %v2268_v13, %v2267_v10 }
 0x445   :  { %v1539_v55 = vadd.f32 %v1538_v32, %v1474_v20  ;;  %v1678_v20 = vrot.slane %v4021_v56, 6  ;;  %v1594_v32 = vrot.slane %v1555_v18, 1  ;;  %v2271_v17 = vsel %vm1679_vm10, %v2270_v41, %v2269_v7 }
 0x446   :  { %v2273_v10 = vsel %vm1682_vm11, %v2272_v0, %v2271_v17  ;;  %v2389_v0 = vrot.slane %v4287_v62, 2 }
 0x447   :  { %v1556_v50 = vmax.f32 %v1539_v55, 0.0  ;;  %v2149_v55 = vsel %vm1679_vm10, %v2148_v15, %v2147_v24  ;;  %v1680_v15 = vsel %vm1679_vm10, %v1678_v20, %v3999_v22 }
 0x448   :  { %v2151_v37 = vsel %vm1682_vm11, %v2150_v11, %v2149_v55 }
 0x449   :  { %v1595_v25 = vrot.slane %v1556_v50, 1  ;;  %v2153_v41 = vsel %vm1685_vm12, %v2152_v61, %v2151_v37  ;;  %v2390_v61 = vsel %vm1673_vm8, %v2389_v0, %v3858_v43 }
 0x44b   :  { %v1596_v57 = vsel %vm996_vm4, %v1594_v32, %v1595_v25  ;;  %v4332_v47 = vmax.f32 %v1556_v50, %v1595_v25  ;;  %v1683_v50 = vsel %vm1682_vm11, %v1681_v58, %v1680_v15  ;;  %v2275_v32 = vsel %vm1685_vm12, %v2274_v31, %v2273_v10 }
 0x44c   :  { %v4336_v60 = vmax.f32 %v1555_v18, %v1596_v57  ;;  %v1686_v20 = vsel %vm1685_vm12, %v1684_v4, %v1683_v50  ;;  %v2391_v58 = vrot.slane %v4292_v53, 1  ;;  %v2394_v4 = vrot.slane %v4307_v21, 7 }
 0x44d   :  { %v2154_v13 = vrot.slane %v4332_v47, 1  ;;  %v2276_v24 = vrot.slane %v4332_v47, 3  ;;  %v2398_v31 = vrot.slane %v4332_v47, 5  ;;  %v2513_v10 = vrot.slane %v4292_v53, 3 }
 0x44e   :  { %v1687_v18 = vrot.slane %v4336_v60, 3  ;;  %v2024_v25 = vrot.slane %v4336_v60, 7  ;;  %v2392_v7 = vsel %vm1676_vm9, %v2391_v58, %v2390_v61  ;;  %v1800_v50 = vrot.slane %v4021_v56, 4  ;;  %v4807_v61 = vld [vmem:[#allocation6_spill] sm:$0xff] }
 0x44f   :  { %v4350_v11 = vsel %vm1688_vm13, %v2154_v13, %v2153_v41  ;;  %v4353_v22 = vsel %vm1688_vm13, %v2276_v24, %v2275_v32  ;;  %v2393_v57 = vsel %vm1679_vm10, %v4297_v16, %v2392_v7  ;;  %v2511_v13 = vrot.slane %v4287_v62, 4 }
 0x450   :  { %2682 = vmatmul.msk.f32.vlgmr.msrb.gmra.mxu1 %vm1321_vm5, %v4350_v11  ;;  %2686 = vmatmul.msk.f32.vlgmr.msrb.gmra.mxu0 %vm1321_vm5, %v4353_v22  ;;  %v1689_v37 = vsel %vm1688_vm13, %v1687_v18, %v1686_v20  ;;  %v4367_v55 = vsel %vm1688_vm13, %v2024_v25, %v4149_v12  ;;  %v2396_v12 = vrot.slane %v4314_v2, 6  ;;  %v2395_v43 = vsel %vm1682_vm11, %v2394_v4, %v2393_v57  ;;  %v4806_v4 = vld [vmem:[#allocation12_spill] sm:$0xff] }
 0x451   :  { %2348 = vmatpush.msrb.mxu1 %v4168_v36  ;;  %2666 = vmatmul.msk.f32.vlgmr.msra.gmra.mxu2 %vm1321_vm5, %v1689_v37  ;;  %v2515_v24 = vrot.slane %v4297_v16, 2  ;;  %v2517_v62 = vrot.slane %v4307_v21, 1  ;;  %v1802_v53 = vrot.slane %v4038_v33, 3  ;;  %v2512_v16 = vsel %vm1673_vm8, %v2511_v13, %v3861_v8 }
 0x452   :  { %2667 = vmatmul.msk.f32.vlgmr.msra.gmra.mxu3 %vm1321_vm5, %v1689_v37  ;;  %1818 = vmatpush.msra.mxu2 %v4045_v34  ;;  %v2397_v17 = vsel %vm1685_vm12, %v2396_v12, %v2395_v43  ;;  %v1804_v41 = vrot.slane %v4124_v26, 2  ;;  %v2514_v21 = vsel %vm1676_vm9, %v2513_v10, %v2512_v16  ;;  %v2520_v32 = vrot.slane %v4332_v47, 7  ;;  %v4808_v12 = vld [vmem:[#allocation25_spill] sm:$0xff] }
 0x453   :  { %1838 = vmatpush.msra.mxu3 %v4055_v51  ;;  %2532 = vmatpush.msrb.mxu0 %v4045_v34  ;;  %v4396_v15 = vsel %vm1688_vm13, %v2398_v31, %v2397_v17  ;;  %v1806_v18 = vrot.slane %v4336_v60, 1  ;;  %v2516_v25 = vsel %vm1679_vm10, %v2515_v24, %v2514_v21  ;;  %v1801_v8 = vsel %vm1679_vm10, %v1800_v50, %v3991_v35  ;;  %v4809_v43 = vld [vmem:[#allocation5_spill] sm:$0xff] }
 0x454   :  { %2349 = vmatpush.msrb.mxu1 %v4186_v48  ;;  %1819 = vmatpush.msra.mxu2 %v4063_v49  ;;  %v2518_v20 = vsel %vm1682_vm11, %v2517_v62, %v2516_v25  ;;  %v1803_v0 = vsel %vm1682_vm11, %v1802_v53, %v1801_v8  ;;  %v1898_v7 = vrot.slane %v4038_v33, 7  ;;  %v1900_v31 = vrot.slane %v4124_v26, 6 }
 0x455   :  { %1839 = vmatpush.msra.mxu3 %v4070_v42  ;;  %2533 = vmatpush.msrb.mxu0 %v4063_v49  ;;  %v2519_v47 = vsel %vm1685_vm12, %v4314_v2, %v2518_v20  ;;  %v4805_v2 = vld [vmem:[#allocation18_spill] sm:$0xff]  ;;  %v1902_v57 = vrot.slane %v4336_v60, 5  ;;  %v1897_v17 = vsel %vm1679_vm10, %v4021_v56, %v4809_v43  ;;  %vm2617_vm4 = vcmask 56320  }
 0x456   :  { %2350 = vmatpush.msrb.mxu1 %v4200_v23  ;;  %1820 = vmatpush.msra.mxu2 %v4075_v46  ;;  %v4446_v35 = vsel %vm1688_vm13, %v2520_v32, %v2519_v47  ;;  %v1899_v33 = vsel %vm1682_vm11, %v1898_v7, %v1897_v17 }
 0x457   :  { %1840 = vmatpush.msra.mxu3 %v4080_v54  ;;  %2534 = vmatpush.msrb.mxu0 %v4075_v46  ;;  %v1901_v26 = vsel %vm1685_vm12, %v1900_v31, %v1899_v33 }
 0x458   :  { %2351 = vmatpush.msrb.mxu1 %v4214_v38  ;;  %1821 = vmatpush.msra.mxu2 %v4088_v1  ;;  %v1903_v60 = vsel %vm1688_vm13, %v1902_v57, %v1901_v26 }
 0x459   :  { %1841 = vmatpush.msra.mxu3 %v4095_v29  ;;  %2535 = vmatpush.msrb.mxu0 %v4088_v1 }
 0x45a   :  { %2685 = vmatmul.msk.f32.vlgmr.msra.gmra.mxu1 %vm1321_vm5, %v4350_v11  ;;  %2690 = vmatmul.msk.f32.vlgmr.msra.gmra.mxu0 %vm1321_vm5, %v4396_v15 }
 0x45b   :  { %2352 = vmatpush.msrb.mxu1 %v4228_v28  ;;  %2668 = vmatmul.msk.f32.vlgmr.msrb.gmra.mxu2 %vm1321_vm5, %v1689_v37 }
 0x45c   :  { %2669 = vmatmul.msk.f32.vlgmr.msrb.gmra.mxu3 %vm1321_vm5, %v1689_v37  ;;  %1822 = vmatpush.msra.mxu2 %v4106_v59  ;;  %v1805_v37 = vsel %vm1685_vm12, %v1804_v41, %v1803_v0 }
 0x45d   :  { %1842 = vmatpush.msra.mxu3 %v4113_v6  ;;  %2536 = vmatpush.msrb.mxu0 %v4106_v59  ;;  %v1807_v58 = vsel %vm1688_vm13, %v1806_v18, %v1805_v37 }
 0x45e   :  { %2353 = vmatpush.msrb.mxu1 %v4242_v14  ;;  %1823 = vmatpush.msra.mxu2 %v4122_v44 }
 0x45f   :  { %1843 = vmatpush.msra.mxu3 %v4131_v52  ;;  %2537 = vmatpush.msrb.mxu0 %v4122_v44 }
 0x460   :  { %2354 = vmatpush.msrb.mxu1 %v4254_v9  ;;  %1824 = vmatpush.msra.mxu2 %v4138_v39 }
 0x461   :  { %1844 = vmatpush.msra.mxu3 %v4145_v30  ;;  %2538 = vmatpush.msrb.mxu0 %v4138_v39 }
 0x462   :  { %2355 = vmatpush.msrb.mxu1 %v4268_v5  ;;  %1825 = vmatpush.msra.mxu2 %v4156_v45 }
 0x463   :  { %1845 = vmatpush.msra.mxu3 %v4163_v40  ;;  %2539 = vmatpush.msrb.mxu0 %v4156_v45 }
 0x464   :  { %2470 = vmatpush.msra.mxu1 %v4168_v36  ;;  %1858 = vmatpush.msrb.mxu2 %v4179_v19 }
 0x465   :  { %1878 = vmatpush.msrb.mxu3 %v4168_v36  ;;  %2689 = vmatmul.msk.f32.vlgmr.msrb.gmra.mxu1 %vm1321_vm5, %v4353_v22 }
 0x466   :  { %2694 = vmatmul.msk.f32.vlgmr.msrb.gmra.mxu0 %vm1321_vm5, %v4446_v35  ;;  %2670 = vmatmul.msk.f32.vlgmr.msra.gmra.mxu2 %vm1321_vm5, %v1807_v58 }
 0x467   :  { %2671 = vmatmul.msk.f32.vlgmr.msra.gmra.mxu3 %vm1321_vm5, %v1807_v58  ;;  %2471 = vmatpush.msra.mxu1 %v4186_v48 }
 0x468   :  { %1859 = vmatpush.msrb.mxu2 %v4193_v3  ;;  %1879 = vmatpush.msrb.mxu3 %v4186_v48 }
 0x469   :  { %2472 = vmatpush.msra.mxu1 %v4200_v23 }
 0x46a   :  { %1860 = vmatpush.msrb.mxu2 %v4207_v63  ;;  %1880 = vmatpush.msrb.mxu3 %v4200_v23 }
 0x46b   :  { %2473 = vmatpush.msra.mxu1 %v4214_v38 }
 0x46c   :  { %1861 = vmatpush.msrb.mxu2 %v4221_v27  ;;  %1881 = vmatpush.msrb.mxu3 %v4214_v38 }
 0x46d   :  { %2474 = vmatpush.msra.mxu1 %v4228_v28 }
 0x46e   :  { %1862 = vmatpush.msrb.mxu2 %v4805_v2  ;;  %1882 = vmatpush.msrb.mxu3 %v4228_v28 }
 0x46f   :  { %2475 = vmatpush.msra.mxu1 %v4242_v14 }
 0x470   :  { %1863 = vmatpush.msrb.mxu2 %v4806_v4  ;;  %1883 = vmatpush.msrb.mxu3 %v4242_v14 }
 0x471   :  { %2476 = vmatpush.msra.mxu1 %v4254_v9 }
 0x472   :  { %1864 = vmatpush.msrb.mxu2 %v4807_v61  ;;  %1884 = vmatpush.msrb.mxu3 %v4254_v9 }
 0x473   :  { %2477 = vmatpush.msra.mxu1 %v4268_v5 }
 0x474   :  { %1865 = vmatpush.msrb.mxu2 %v4808_v12  ;;  %1885 = vmatpush.msrb.mxu3 %v4268_v5 }
 0x475   :  { %2693 = vmatmul.msk.f32.vlgmr.msra.gmra.mxu1 %vm1321_vm5, %v4396_v15  ;;  %2672 = vmatmul.msk.f32.vlgmr.msrb.gmra.mxu2 %vm1321_vm5, %v1807_v58 }
 0x476   :  { %2592 = vmatpush.msrb.mxu1 %v4168_v36  ;;  %2673 = vmatmul.msk.f32.vlgmr.msrb.gmra.mxu3 %vm1321_vm5, %v1807_v58 }
 0x477   :  { %1914 = vmatpush.msra.mxu2 %v4045_v34  ;;  %1934 = vmatpush.msra.mxu3 %v4055_v51 }
 0x478   :  { %2593 = vmatpush.msrb.mxu1 %v4186_v48 }
 0x479   :  { %1915 = vmatpush.msra.mxu2 %v4063_v49  ;;  %1935 = vmatpush.msra.mxu3 %v4070_v42 }
 0x47a   :  { %2594 = vmatpush.msrb.mxu1 %v4200_v23 }
 0x47b   :  { %1916 = vmatpush.msra.mxu2 %v4075_v46  ;;  %1936 = vmatpush.msra.mxu3 %v4080_v54 }
 0x47c   :  { %2595 = vmatpush.msrb.mxu1 %v4214_v38 }
 0x47d   :  { %1917 = vmatpush.msra.mxu2 %v4088_v1  ;;  %1937 = vmatpush.msra.mxu3 %v4095_v29 }
 0x47e   :  { %2596 = vmatpush.msrb.mxu1 %v4228_v28 }
 0x47f   :  { %1918 = vmatpush.msra.mxu2 %v4106_v59  ;;  %1938 = vmatpush.msra.mxu3 %v4113_v6 }
 0x480   :  { %2597 = vmatpush.msrb.mxu1 %v4242_v14 }
 0x481   :  { %1919 = vmatpush.msra.mxu2 %v4122_v44  ;;  %1939 = vmatpush.msra.mxu3 %v4131_v52 }
 0x482   :  { %2598 = vmatpush.msrb.mxu1 %v4254_v9 }
 0x483   :  { %1920 = vmatpush.msra.mxu2 %v4138_v39  ;;  %1940 = vmatpush.msra.mxu3 %v4145_v30 }
 0x484   :  { %2599 = vmatpush.msrb.mxu1 %v4268_v5 }
 0x485   :  { %1921 = vmatpush.msra.mxu2 %v4156_v45  ;;  %1941 = vmatpush.msra.mxu3 %v4163_v40 }
 0x486   :  { %2697 = vmatmul.msk.f32.vlgmr.msrb.gmra.mxu1 %vm1321_vm5, %v4446_v35  ;;  %2674 = vmatmul.msk.f32.vlgmr.msra.gmra.mxu2 %vm1321_vm5, %v1903_v60 }
 0x487   :  { %2675 = vmatmul.msk.f32.vlgmr.msra.gmra.mxu3 %vm1321_vm5, %v1903_v60  ;;  %1954 = vmatpush.msrb.mxu2 %v4179_v19 }
 0x488   :  { %1974 = vmatpush.msrb.mxu3 %v4168_v36 }
 0x489   :  { %1955 = vmatpush.msrb.mxu2 %v4193_v3 }
 0x48a   :  { %1975 = vmatpush.msrb.mxu3 %v4186_v48 }
 0x48b   :  { %1956 = vmatpush.msrb.mxu2 %v4207_v63 }
 0x48c   :  { %1976 = vmatpush.msrb.mxu3 %v4200_v23 }
 0x48d   :  { %1957 = vmatpush.msrb.mxu2 %v4221_v27 }
 0x48e   :  { %1977 = vmatpush.msrb.mxu3 %v4214_v38 }
 0x48f   :  { %1958 = vmatpush.msrb.mxu2 %v4805_v2 }
 0x490   :  { %1978 = vmatpush.msrb.mxu3 %v4228_v28 }
 0x491   :  { %1959 = vmatpush.msrb.mxu2 %v4806_v4 }
 0x492   :  { %1979 = vmatpush.msrb.mxu3 %v4242_v14 }
 0x493   :  { %1960 = vmatpush.msrb.mxu2 %v4807_v61 }
 0x494   :  { %1980 = vmatpush.msrb.mxu3 %v4254_v9 }
 0x495   :  { %1961 = vmatpush.msrb.mxu2 %v4808_v12 }
 0x496   :  { %1981 = vmatpush.msrb.mxu3 %v4268_v5  ;;  %2676 = vmatmul.msk.f32.vlgmr.msrb.gmra.mxu2 %vm1321_vm5, %v1903_v60 }
 0x497   :  { %2677 = vmatmul.msk.f32.vlgmr.msrb.gmra.mxu3 %vm1321_vm5, %v1903_v60  ;;  %2036 = vmatpush.msra.mxu2 %v4045_v34 }
 0x498   :  { %2056 = vmatpush.msra.mxu3 %v4055_v51 }
 0x499   :  { %2037 = vmatpush.msra.mxu2 %v4063_v49 }
 0x49a   :  { %2057 = vmatpush.msra.mxu3 %v4070_v42 }
 0x49b   :  { %2038 = vmatpush.msra.mxu2 %v4075_v46 }
 0x49c   :  { %2058 = vmatpush.msra.mxu3 %v4080_v54 }
 0x49d   :  { %2039 = vmatpush.msra.mxu2 %v4088_v1 }
 0x49e   :  { %2059 = vmatpush.msra.mxu3 %v4095_v29 }
 0x49f   :  { %2040 = vmatpush.msra.mxu2 %v4106_v59 }
 0x4a0   :  { %2060 = vmatpush.msra.mxu3 %v4113_v6 }
 0x4a1   :  { %2041 = vmatpush.msra.mxu2 %v4122_v44 }
 0x4a2   :  { %2061 = vmatpush.msra.mxu3 %v4131_v52 }
 0x4a3   :  { %2042 = vmatpush.msra.mxu2 %v4138_v39 }
 0x4a4   :  { %2062 = vmatpush.msra.mxu3 %v4145_v30 }
 0x4a5   :  { %2043 = vmatpush.msra.mxu2 %v4156_v45 }
 0x4a6   :  { %2063 = vmatpush.msra.mxu3 %v4163_v40  ;;  %2678 = vmatmul.msk.f32.vlgmr.msra.gmra.mxu2 %vm1321_vm5, %v4367_v55 }
 0x4a7   :  { %2679 = vmatmul.msk.f32.vlgmr.msra.gmra.mxu3 %vm1321_vm5, %v4367_v55  ;;  %2076 = vmatpush.msrb.mxu2 %v4179_v19 }
 0x4a8   :  { %2096 = vmatpush.msrb.mxu3 %v4168_v36 }
 0x4a9   :  { %2077 = vmatpush.msrb.mxu2 %v4193_v3 }
 0x4aa   :  { %2097 = vmatpush.msrb.mxu3 %v4186_v48 }
 0x4ab   :  { %2078 = vmatpush.msrb.mxu2 %v4207_v63 }
 0x4ac   :  { %2098 = vmatpush.msrb.mxu3 %v4200_v23 }
 0x4ad   :  { %2079 = vmatpush.msrb.mxu2 %v4221_v27 }
 0x4ae   :  { %2099 = vmatpush.msrb.mxu3 %v4214_v38 }
 0x4af   :  { %2080 = vmatpush.msrb.mxu2 %v4805_v2 }
 0x4b0   :  { %2100 = vmatpush.msrb.mxu3 %v4228_v28 }
 0x4b1   :  { %2081 = vmatpush.msrb.mxu2 %v4806_v4 }
 0x4b2   :  { %2101 = vmatpush.msrb.mxu3 %v4242_v14 }
 0x4b3   :  { %2082 = vmatpush.msrb.mxu2 %v4807_v61 }
 0x4b4   :  { %2102 = vmatpush.msrb.mxu3 %v4254_v9 }
 0x4b5   :  { %2083 = vmatpush.msrb.mxu2 %v4808_v12 }
 0x4b6   :  { %2103 = vmatpush.msrb.mxu3 %v4268_v5  ;;  %2680 = vmatmul.msk.f32.vlgmr.msrb.gmra.mxu2 %vm1321_vm5, %v4367_v55 }
 0x4b7   :  { %2681 = vmatmul.msk.f32.vlgmr.msrb.gmra.mxu3 %vm1321_vm5, %v4367_v55  ;;  %2186 = vmatpush.msra.mxu2 %v4055_v51 }
 0x4b8   :  { %2206 = vmatpush.msra.mxu3 %v4179_v19 }
 0x4b9   :  { %2187 = vmatpush.msra.mxu2 %v4070_v42 }
 0x4ba   :  { %2207 = vmatpush.msra.mxu3 %v4193_v3 }
 0x4bb   :  { %2188 = vmatpush.msra.mxu2 %v4080_v54 }
 0x4bc   :  { %2208 = vmatpush.msra.mxu3 %v4207_v63 }
 0x4bd   :  { %2189 = vmatpush.msra.mxu2 %v4095_v29 }
 0x4be   :  { %2209 = vmatpush.msra.mxu3 %v4221_v27 }
 0x4bf   :  { %2190 = vmatpush.msra.mxu2 %v4113_v6 }
 0x4c0   :  { %2210 = vmatpush.msra.mxu3 %v4805_v2 }
 0x4c1   :  { %2191 = vmatpush.msra.mxu2 %v4131_v52 }
 0x4c2   :  { %2211 = vmatpush.msra.mxu3 %v4806_v4 }
 0x4c3   :  { %2192 = vmatpush.msra.mxu2 %v4145_v30 }
 0x4c4   :  { %2212 = vmatpush.msra.mxu3 %v4807_v61 }
 0x4c5   :  { %2193 = vmatpush.msra.mxu2 %v4163_v40 }
 0x4c6   :  { %2213 = vmatpush.msra.mxu3 %v4808_v12  ;;  %2683 = vmatmul.msk.f32.vlgmr.msra.gmra.mxu2 %vm1321_vm5, %v4350_v11 }
 0x4c7   :  { %2684 = vmatmul.msk.f32.vlgmr.msra.gmra.mxu3 %vm1321_vm5, %v4350_v11  ;;  %2308 = vmatpush.msrb.mxu2 %v4055_v51 }
 0x4c8   :  { %2328 = vmatpush.msrb.mxu3 %v4179_v19 }
 0x4c9   :  { %2309 = vmatpush.msrb.mxu2 %v4070_v42 }
 0x4ca   :  { %2329 = vmatpush.msrb.mxu3 %v4193_v3 }
 0x4cb   :  { %2310 = vmatpush.msrb.mxu2 %v4080_v54 }
 0x4cc   :  { %2330 = vmatpush.msrb.mxu3 %v4207_v63 }
 0x4cd   :  { %2311 = vmatpush.msrb.mxu2 %v4095_v29  ;;  %v2175_v56 = vpop.f32.mrf.mxu1  ;;  %v2297_v34 = vpop.f32.mrf.mxu0 }
 0x4ce   :  { %2331 = vmatpush.msrb.mxu3 %v4221_v27  ;;  %2367 = vrot.lane.b32.xlu1 %v2297_v34, %s2926_s3 }
 0x4cf   :  { %2312 = vmatpush.msrb.mxu2 %v4113_v6  ;;  %2245 = vrot.lane.b32.xlu0 %v2175_v56, %s2927_s20 }
 0x4d0   :  { %2332 = vmatpush.msrb.mxu3 %v4805_v2 }
 0x4d1   :  { %2313 = vmatpush.msrb.mxu2 %v4131_v52 }
 0x4d2   :  { %2333 = vmatpush.msrb.mxu3 %v4806_v4 }
 0x4d3   :  { %2314 = vmatpush.msrb.mxu2 %v4145_v30 }
 0x4d4   :  { %2334 = vmatpush.msrb.mxu3 %v4807_v61  ;;  %v1709_v46 = vpop.f32.mrf.mxu2 }
 0x4d5   :  { %2315 = vmatpush.msrb.mxu2 %v4163_v40  ;;  %v1729_v49 = vpop.f32.mrf.mxu3 }
 0x4d6   :  { %2335 = vmatpush.msrb.mxu3 %v4808_v12  ;;  %2687 = vmatmul.msk.f32.vlgmr.msrb.gmra.mxu2 %vm1321_vm5, %v4353_v22 }
 0x4d7   :  { %2688 = vmatmul.msk.f32.vlgmr.msrb.gmra.mxu3 %vm1321_vm5, %v4353_v22  ;;  %2430 = vmatpush.msra.mxu2 %v4055_v51  ;;  %v2235_v1 = vpop.f32.mrf.mxu1  ;;  %v2419_v59 = vpop.f32.mrf.mxu0 }
 0x4d8   :  { %2450 = vmatpush.msra.mxu3 %v4179_v19  ;;  %2239 = vrot.lane.b32.xlu2 %v2235_v1, %s2927_s20 }
 0x4d9   :  { %2431 = vmatpush.msra.mxu2 %v4070_v42  ;;  %1781 = vrot.lane.b32.xlu1 %v1729_v49, %s2928_s1 }
 0x4da   :  { %2451 = vmatpush.msra.mxu3 %v4193_v3  ;;  %1779 = vrot.lane.b32.xlu0 %v1709_v46, %s2928_s1 }
 0x4db   :  { %2432 = vmatpush.msra.mxu2 %v4080_v54 }
 0x4dc   :  { %2452 = vmatpush.msra.mxu3 %v4207_v63 }
 0x4dd   :  { %2433 = vmatpush.msra.mxu2 %v4095_v29 }
 0x4de   :  { %2453 = vmatpush.msra.mxu3 %v4221_v27  ;;  %v1749_v45 = vpop.f32.mrf.mxu2 }
 0x4df   :  { %2434 = vmatpush.msra.mxu2 %v4113_v6  ;;  %v1769_v39 = vpop.f32.mrf.mxu3 }
 0x4e0   :  { %2454 = vmatpush.msra.mxu3 %v4805_v2  ;;  %2489 = vrot.lane.b32.xlu2 %v2419_v59, %s2929_s21 }
 0x4e1   :  { %2435 = vmatpush.msra.mxu2 %v4131_v52 }
 0x4e2   :  { %2455 = vmatpush.msra.mxu3 %v4806_v4  ;;  %v2357_v44 = vpop.f32.mrf.mxu1 }
 0x4e3   :  { %2436 = vmatpush.msra.mxu2 %v4145_v30  ;;  %2361 = vrot.lane.b32.xlu0 %v2357_v44, %s2926_s3  ;;  %v2541_v11 = vpop.f32.mrf.mxu0 }
 0x4e4   :  { %2456 = vmatpush.msra.mxu3 %v4807_v61 }
 0x4e5   :  { %2437 = vmatpush.msra.mxu2 %v4163_v40 }
 0x4e6   :  { %2457 = vmatpush.msra.mxu3 %v4808_v12  ;;  %2691 = vmatmul.msk.f32.vlgmr.msra.gmra.mxu2 %vm1321_vm5, %v4396_v15 }
 0x4e7   :  { %2692 = vmatmul.msk.f32.vlgmr.msra.gmra.mxu3 %vm1321_vm5, %v4396_v15  ;;  %2552 = vmatpush.msrb.mxu2 %v4055_v51 }
 0x4e8   :  { %2572 = vmatpush.msrb.mxu3 %v4179_v19  ;;  %1773 = vrot.lane.b32.xlu2 %v1769_v39, %s2928_s1 }
 0x4e9   :  { %2553 = vmatpush.msrb.mxu2 %v4070_v42  ;;  %v4663_v42 = vpop.f32.mrf.mxu2 }
 0x4ea   :  { %2573 = vmatpush.msrb.mxu3 %v4193_v3 }
 0x4eb   :  { %2554 = vmatpush.msrb.mxu2 %v4080_v54  ;;  %v4665_v54 = vpop.f32.mrf.mxu3 }
 0x4ec   :  { %2574 = vmatpush.msrb.mxu3 %v4207_v63 }
 0x4ed   :  { %2555 = vmatpush.msrb.mxu2 %v4095_v29 }
 0x4ee   :  { %2575 = vmatpush.msrb.mxu3 %v4221_v27 }
 0x4ef   :  { %2556 = vmatpush.msrb.mxu2 %v4113_v6 }
 0x4f0   :  { %2576 = vmatpush.msrb.mxu3 %v4805_v2  ;;  %1783 = vrot.lane.b32.xlu2 %v1749_v45, %s2928_s1 }
 0x4f1   :  { %2557 = vmatpush.msrb.mxu2 %v4131_v52 }
 0x4f2   :  { %2577 = vmatpush.msrb.mxu3 %v4806_v4  ;;  %v2479_v51 = vpop.f32.mrf.mxu1 }
 0x4f3   :  { %2558 = vmatpush.msrb.mxu2 %v4145_v30  ;;  %2483 = vrot.lane.b32.xlu1 %v2479_v51, %s2929_s21 }
 0x4f4   :  { %2578 = vmatpush.msrb.mxu3 %v4807_v61 }
 0x4f5   :  { %2559 = vmatpush.msrb.mxu2 %v4163_v40 }
 0x4f6   :  { %2579 = vmatpush.msrb.mxu3 %v4808_v12  ;;  %2695 = vmatmul.msk.f32.vlgmr.msrb.gmra.mxu2 %vm1321_vm5, %v4446_v35 }
 0x4f7   :  { %2696 = vmatmul.msk.f32.vlgmr.msrb.gmra.mxu3 %vm1321_vm5, %v4446_v35 }
 0x4f8   :  { %v4667_v29 = vpop.f32.mrf.mxu2 }
 0x4f9   :  { %v4669_v6 = vpop.f32.mrf.mxu3 }
 0x503   :  { %v2601_v52 = vpop.f32.mrf.mxu1 }
 0x504   :  { %2605 = vrot.lane.b32.xlu2 %v2601_v52, %s2930_s22 }
 0x509   :  { %v1923_v30 = vpop.f32.mrf.mxu2 }
 0x50a   :  { %v1943_v40 = vpop.f32.mrf.mxu3  ;;  %1993 = vrot.lane.b32.xlu1 %v1923_v30, %s2931_s23 }
 0x50c   :  { %1995 = vrot.lane.b32.xlu2 %v1943_v40, %s2931_s23 }
 0x519   :  { %v1963_v19 = vpop.f32.mrf.mxu2 }
 0x51a   :  { %v1983_v36 = vpop.f32.mrf.mxu3 }
 0x51b   :  { %1987 = vrot.lane.b32.xlu0 %v1983_v36, %s2931_s23 }
 0x523   :  { %1997 = vrot.lane.b32.xlu0 %v1963_v19, %s2931_s23 }
 0x529   :  { %v2045_v48 = vpop.f32.mrf.mxu2 }
 0x52a   :  { %v2065_v3 = vpop.f32.mrf.mxu3  ;;  %2115 = vrot.lane.b32.xlu2 %v2045_v48, %s2932_s24 }
 0x52b   :  { %2117 = vrot.lane.b32.xlu0 %v2065_v3, %s2932_s24 }
 0x532   :  { %v2240_v22 = vpop.permute.xlu2 %2239 }
 0x539   :  { %v2085_v63 = vpop.f32.mrf.mxu2 }
 0x53a   :  { %v2105_v23 = vpop.f32.mrf.mxu3  ;;  %v4681_v13 = vpop.permute.xlu2 %2489 }
 0x53b   :  { %2109 = vrot.lane.b32.xlu1 %v2105_v23, %s2932_s24 }
 0x540   :  { %v2368_v50 = vpop.permute.xlu1 %2367 }
 0x541   :  { %v2246_v10 = vpop.permute.xlu0 %2245 }
 0x542   :  { %v1774_v24 = vpop.permute.xlu2 %1773  ;;  %v2259_v19 = vsel %vm2251_vm1, %v2240_v22, %v2246_v10 }
 0x543   :  { %2119 = vrot.lane.b32.xlu1 %v2085_v63, %s2932_s24 }
 0x549   :  { %v2195_v38 = vpop.f32.mrf.mxu2 }
 0x54a   :  { %v2215_v27 = vpop.f32.mrf.mxu3  ;;  %v1784_v53 = vpop.permute.xlu2 %1783 }
 0x54b   :  { %2249 = vrot.lane.b32.xlu2 %v2215_v27, %s2927_s20  ;;  %2247 = vrot.lane.b32.xlu1 %v2195_v38, %s2927_s20  ;;  %v1782_v16 = vpop.permute.xlu1 %1781  ;;  %v1788_v56 = vsel %vm1785_vm14, %v1784_v53, %v1774_v24 }
 0x54c   :  { %v1780_v62 = vpop.permute.xlu0 %1779  ;;  %v1888_v46 = vadd.f32 %v4669_v6, %v1788_v56  ;;  %v1787_v27 = vsel %vm1785_vm14, %v1782_v16, %v1784_v53 }
 0x54d   :  { %v1786_v58 = vsel %vm1785_vm14, %v1780_v62, %v1782_v16  ;;  %v1793_v34 = vsel %vm1785_vm14, %v1774_v24, %v1780_v62 }
 0x54e   :  { %v1848_v61 = vadd.f32 %v4665_v54, %v1786_v58  ;;  %v1828_v59 = vadd.f32 %v4663_v42, %v1793_v34 }
 0x555   :  { %v2362_v21 = vpop.permute.xlu0 %2361 }
 0x559   :  { %v2317_v28 = vpop.f32.mrf.mxu2 }
 0x55a   :  { %v2337_v14 = vpop.f32.mrf.mxu3  ;;  %2369 = vrot.lane.b32.xlu2 %v2317_v28, %s2926_s3  ;;  %v2381_v28 = vsel %vm2373_vm2, %v2362_v21, %v2368_v50 }
 0x55b   :  { %2371 = vrot.lane.b32.xlu0 %v2337_v14, %s2926_s3 }
 0x55e   :  { %v4683_v41 = vpop.permute.xlu2 %2605 }
 0x565   :  { %v2484_v32 = vpop.permute.xlu1 %2483 }
 0x566   :  { %v1996_v25 = vpop.permute.xlu2 %1995 }
 0x569   :  { %v2439_v9 = vpop.f32.mrf.mxu2 }
 0x56a   :  { %v2459_v5 = vpop.f32.mrf.mxu3  ;;  %2491 = vrot.lane.b32.xlu0 %v2439_v9, %s2929_s21 }
 0x56b   :  { %2493 = vrot.lane.b32.xlu1 %v2459_v5, %s2929_s21 }
 0x572   :  { %2611 = vrot.lane.b32.xlu0 %v2541_v11, %s2930_s22 }
 0x579   :  { %v2561_v55 = vpop.f32.mrf.mxu2 }
 0x57a   :  { %v2581_v15 = vpop.f32.mrf.mxu3  ;;  %2613 = vrot.lane.b32.xlu1 %v2561_v55, %s2930_s22  ;;  %v1868_v55 = vadd.f32 %v4667_v29, %v1787_v27 }
 0x57b   :  { %2615 = vrot.lane.b32.xlu2 %v2581_v15, %s2930_s22  ;;  %v2503_v15 = vsel %vm2495_vm3, %v2484_v32, %v4681_v13 }
 0x57c   :  { %v1994_v8 = vpop.permute.xlu1 %1993 }
 0x57d   :  { %v2000_v4 = vsel %vm1999_vm15, %v1994_v8, %v1996_v25 }
 0x57e   :  { %v2009_v7 = vadd.f32 %v2000_v4, %v1848_v61 }
 0x584   :  { %v2116_v20 = vpop.permute.xlu2 %2115 }
 0x58d   :  { %v1988_v18 = vpop.permute.xlu0 %1987 }
 0x58e   :  { %v2007_v1 = vsel %vm1999_vm15, %v1988_v18, %v1994_v8 }
 0x58f   :  { %v2008_v54 = vadd.f32 %v2007_v1, %v1828_v59 }
 0x595   :  { %v1998_v0 = vpop.permute.xlu0 %1997 }
 0x596   :  { %v2002_v49 = vsel %vm1999_vm15, %v1998_v0, %v1988_v18  ;;  %v2001_v11 = vsel %vm1999_vm15, %v1996_v25, %v1998_v0 }
 0x597   :  { %v2011_v45 = vadd.f32 %v2002_v49, %v1888_v46  ;;  %v2010_v24 = vadd.f32 %v2001_v11, %v1868_v55 }
 0x59d   :  { %v2118_v2 = vpop.permute.xlu0 %2117 }
 0x59e   :  { %v2122_v12 = vsel %vm2121_vm0, %v2116_v20, %v2118_v2 }
 0x59f   :  { %v2131_v31 = vadd.f32 %v2122_v12, %v2009_v7 }
 0x5a5   :  { %v2250_v37 = vpop.permute.xlu2 %2249 }
 0x5a6   :  { %v2254_v40 = vsel %vm2251_vm1, %v2250_v37, %v2240_v22 }
 0x5ad   :  { %v2110_v47 = vpop.permute.xlu1 %2109 }
 0x5ae   :  { %v2129_v51 = vsel %vm2121_vm0, %v2110_v47, %v2116_v20 }
 0x5af   :  { %v2130_v30 = vadd.f32 %v2129_v51, %v2008_v54 }
 0x5b1   :  { %v2260_v48 = vadd.f32 %v2259_v19, %v2130_v30 }
 0x5b3   :  { %v2382_v5 = vadd.f32 %v2381_v28, %v2260_v48 }
 0x5b4   :  { %v2370_v57 = vpop.permute.xlu2 %2369 }
 0x5b5   :  { %v2120_v35 = vpop.permute.xlu1 %2119  ;;  %v2374_v26 = vsel %vm2373_vm2, %v2368_v50, %v2370_v57  ;;  %v2504_v53 = vadd.f32 %v2503_v15, %v2382_v5 }
 0x5b6   :  { %v2124_v44 = vsel %vm2121_vm0, %v2120_v35, %v2110_v47 }
 0x5b7   :  { %v2133_v52 = vadd.f32 %v2124_v44, %v2011_v45 }
 0x5b9   :  { %v2263_v6 = vadd.f32 %v2254_v40, %v2133_v52 }
 0x5bd   :  { %v2248_v43 = vpop.permute.xlu1 %2247 }
 0x5be   :  { %v2252_v17 = vsel %vm2251_vm1, %v2246_v10, %v2248_v43  ;;  %v2123_v10 = vsel %vm2121_vm0, %v2118_v2, %v2120_v35  ;;  %v2253_v50 = vsel %vm2251_vm1, %v2248_v43, %v2250_v37 }
 0x5bf   :  { %v2261_v33 = vadd.f32 %v2252_v17, %v2131_v31 }
 0x5c1   :  { %v2383_v60 = vadd.f32 %v2374_v26, %v2261_v33 }
 0x5cd   :  { %v2372_v39 = vpop.permute.xlu0 %2371 }
 0x5ce   :  { %v2376_v36 = vsel %vm2373_vm2, %v2372_v39, %v2362_v21  ;;  %v2132_v21 = vadd.f32 %v2123_v10, %v2010_v24  ;;  %v2375_v25 = vsel %vm2373_vm2, %v2370_v57, %v2372_v39 }
 0x5cf   :  { %v2385_v42 = vadd.f32 %v2376_v36, %v2263_v6 }
 0x5d0   :  { %v2262_v8 = vadd.f32 %v2253_v50, %v2132_v21 }
 0x5d2   :  { %v2384_v20 = vadd.f32 %v2375_v25, %v2262_v8 }
 0x5d5   :  { %v2616_v23 = vpop.permute.xlu2 %2615 }
 0x5d6   :  { %v2620_v9 = vsel %vm2617_vm4, %v2616_v23, %v4683_v41 }
 0x5dc   :  { %v2492_v3 = vpop.permute.xlu0 %2491 }
 0x5dd   :  { %v2494_v63 = vpop.permute.xlu1 %2493  ;;  %v2496_v29 = vsel %vm2495_vm3, %v4681_v13, %v2492_v3 }
 0x5de   :  { %v2498_v38 = vsel %vm2495_vm3, %v2494_v63, %v2484_v32  ;;  %v2497_v32 = vsel %vm2495_vm3, %v2492_v3, %v2494_v63  ;;  %v2505_v0 = vadd.f32 %v2496_v29, %v2383_v60 }
 0x5df   :  { %v2507_v14 = vadd.f32 %v2498_v38, %v2385_v42  ;;  %v2506_v47 = vadd.f32 %v2497_v32, %v2384_v20 }
 0x5e1   :  { %v2629_v22 = vadd.f32 %v2620_v9, %v2507_v14 }
 0x5e3   :  { %2633 = vst [vmem:[#allocation2 + $0x18] sm:$0xff] %v2629_v22 }
 0x5e4   :  { %v2612_v62 = vpop.permute.xlu0 %2611 }
 0x5e5   :  { %v2625_v16 = vsel %vm2617_vm4, %v4683_v41, %v2612_v62 }
 0x5e6   :  { %v2626_v18 = vadd.f32 %v2625_v16, %v2504_v53 }
 0x5e8   :  { %2630 = vst [vmem:[#allocation2] sm:$0xff] %v2626_v18 }
 0x5ec   :  { %v2614_v35 = vpop.permute.xlu1 %2613 }
 0x5ed   :  { %v2618_v41 = vsel %vm2617_vm4, %v2612_v62, %v2614_v35  ;;  %v2619_v37 = vsel %vm2617_vm4, %v2614_v35, %v2616_v23 }
 0x5ee   :  { %v2627_v58 = vadd.f32 %v2618_v41, %v2505_v0  ;;  %v2628_v2 = vadd.f32 %v2619_v37, %v2506_v47 }
 0x5f0   :  { %2631 = vst [vmem:[#allocation2 + $0x8] sm:$0xff] %v2627_v58 }
 0x5f1   :  { %2632 = vst [vmem:[#allocation2 + $0x10] sm:$0xff] %v2628_v2 }
 0x5f2   :  { %2644 = dma.vmem_to_hbm [thread:$0]  %s2640_s26, 512, %s2642_s7, [#allocation3]  }
 0x5f3   :  { %2921 = dma.done.wait [#allocation3], 512  }
 0x5f4   :  { %2922 = vsyncadd [#allocation3], 4294966784 }
 0x5f5   :  { %2649 = vsyncpa [#allocation3], 1 }

</bundles_post_ra>
